<compile_context>
chip_gen: v5e
topology: v5e:2x2
jax: 0.10.0
libtpu: 0.0.40
codegen_flags: <defaults>
</compile_context>

<pallas_src>
import math
from functools import partial

import jax
import jax.numpy as jnp
from jax.experimental import pallas as pl
from jax.experimental.pallas import tpu as pltpu


# ------------------------------ tiling helpers ------------------------------

def _pick_tile(dim, target, align):
    """Largest tile <= target that is a multiple of `align` and divides `dim`;
    falls back to the full dim (always legal for BlockSpec)."""
    if dim <= target:
        return dim
    t = (target // align) * align
    while t >= align:
        if dim % t == 0:
            return t
        t -= align
    return dim


def _round_up(x, m):
    return ((x + m - 1) // m) * m


# ------------------------------ Pallas kernels ------------------------------

def _linear_kernel(x_ref, w_ref, b_ref, o_ref, acc_ref, *, relu):
    """Tiled matmul with K-accumulation; bias folded into accumulator init."""
    @pl.when(pl.program_id(2) == 0)
    def _():
        acc_ref[...] = jnp.broadcast_to(b_ref[...], acc_ref.shape).astype(jnp.float32)

    acc_ref[...] += jnp.dot(x_ref[...], w_ref[...],
                            preferred_element_type=jnp.float32)

    @pl.when(pl.program_id(2) == pl.num_programs(2) - 1)
    def _():
        y = acc_ref[...]
        if relu:
            y = jnp.maximum(y, 0.0)
        o_ref[...] = y.astype(o_ref.dtype)


def linear(x2d, w, b, relu=False, *, tm=256, tn=256, tk=512):
    M, K = x2d.shape
    N = w.shape[1]
    tm = _pick_tile(M, tm, 8)
    tn = _pick_tile(N, tn, 128)
    tk = _pick_tile(K, tk, 128)
    grid = (M // tm, N // tn, K // tk)
    return pl.pallas_call(
        partial(_linear_kernel, relu=relu),
        grid=grid,
        out_shape=jax.ShapeDtypeStruct((M, N), jnp.float32),
        in_specs=[pl.BlockSpec((tm, tk), lambda i, j, k: (i, k)),
                  pl.BlockSpec((tk, tn), lambda i, j, k: (k, j)),
                  pl.BlockSpec((1, tn), lambda i, j, k: (0, j))],
        out_specs=pl.BlockSpec((tm, tn), lambda i, j, k: (i, j)),
        scratch_shapes=[pltpu.VMEM((tm, tn), jnp.float32)],
        compiler_params=pltpu.CompilerParams(
            dimension_semantics=("parallel", "parallel", "arbitrary")),
    )(x2d, w, b)


def _proj_add_ln_kernel(x_ref, w_ref, b_ref, r_ref, g_ref, be_ref, o_ref, *, eps):
    """out = LayerNorm(x @ w + b + residual)."""
    y = jnp.dot(x_ref[...], w_ref[...], preferred_element_type=jnp.float32)
    z = y + b_ref[...] + r_ref[...]
    mean = jnp.mean(z, axis=-1, keepdims=True)
    var = jnp.mean((z - mean) ** 2, axis=-1, keepdims=True)
    o_ref[...] = (z - mean) * jax.lax.rsqrt(var + eps) * g_ref[...] + be_ref[...]


def proj_add_layernorm(x2d, w, b, res2d, gamma, beta, *, eps=1e-5, tm=256):
    M, K = x2d.shape
    D = w.shape[1]
    tm = _pick_tile(M, tm, 8)
    return pl.pallas_call(
        partial(_proj_add_ln_kernel, eps=eps),
        grid=(M // tm,),
        out_shape=jax.ShapeDtypeStruct((M, D), jnp.float32),
        in_specs=[pl.BlockSpec((tm, K), lambda i: (i, 0)),
                  pl.BlockSpec((K, D), lambda i: (0, 0)),
                  pl.BlockSpec((1, D), lambda i: (0, 0)),
                  pl.BlockSpec((tm, D), lambda i: (i, 0)),
                  pl.BlockSpec((1, D), lambda i: (0, 0)),
                  pl.BlockSpec((1, D), lambda i: (0, 0))],
        out_specs=pl.BlockSpec((tm, D), lambda i: (i, 0)),
        compiler_params=pltpu.CompilerParams(dimension_semantics=("parallel",)),
    )(x2d, w, b, res2d, gamma, beta)


def _ffn_add_ln_kernel(x_ref, w1_ref, b1_ref, w2_ref, b2_ref, g_ref, be_ref,
                       o_ref, *, eps):
    """out = LayerNorm(relu(relu(x@w1+b1)@w2+b2) + x); intermediate stays in VMEM."""
    x = x_ref[...]
    h = jnp.dot(x, w1_ref[...], preferred_element_type=jnp.float32) + b1_ref[...]
    h = jnp.maximum(h, 0.0)
    y = jnp.dot(h, w2_ref[...], preferred_element_type=jnp.float32) + b2_ref[...]
    y = jnp.maximum(y, 0.0)          # reference Feedforward applies ReLU after BOTH linears
    z = y + x
    mean = jnp.mean(z, axis=-1, keepdims=True)
    var = jnp.mean((z - mean) ** 2, axis=-1, keepdims=True)
    o_ref[...] = (z - mean) * jax.lax.rsqrt(var + eps) * g_ref[...] + be_ref[...]


def ffn_add_layernorm(x2d, w1, b1, w2, b2, gamma, beta, *, eps=1e-5, tm=256):
    M, D = x2d.shape
    F = w1.shape[1]
    tm = _pick_tile(M, tm, 8)
    return pl.pallas_call(
        partial(_ffn_add_ln_kernel, eps=eps),
        grid=(M // tm,),
        out_shape=jax.ShapeDtypeStruct((M, D), jnp.float32),
        in_specs=[pl.BlockSpec((tm, D), lambda i: (i, 0)),
                  pl.BlockSpec((D, F), lambda i: (0, 0)),
                  pl.BlockSpec((1, F), lambda i: (0, 0)),
                  pl.BlockSpec((F, D), lambda i: (0, 0)),
                  pl.BlockSpec((1, D), lambda i: (0, 0)),
                  pl.BlockSpec((1, D), lambda i: (0, 0)),
                  pl.BlockSpec((1, D), lambda i: (0, 0))],
        out_specs=pl.BlockSpec((tm, D), lambda i: (i, 0)),
        compiler_params=pltpu.CompilerParams(dimension_semantics=("parallel",)),
    )(x2d, w1, b1, w2, b2, gamma, beta)


def _mha_kernel(*refs, head_num, head_dim, temperature, fused_qkv, has_mask):
    """One batch element per grid step; packed projections split in-kernel;
    heads split in-kernel; lane-dense full-width output write."""
    D = head_num * head_dim
    idx = 0
    if fused_qkv:
        qkv = refs[idx][0]; idx += 1                     # (Lq, 3D)
        q = qkv[:, :D]
        k = qkv[:, D:2 * D]
        v = qkv[:, 2 * D:3 * D]
    else:
        q = refs[idx][0]; idx += 1                       # (Lq, D)
        kv = refs[idx][0]; idx += 1                      # (Lk, 2D)
        k = kv[:, :D]
        v = kv[:, D:2 * D]
    if has_mask:
        m = refs[idx][0]; idx += 1                       # (Lq, Lk) additive mask
    o_ref = refs[idx]

    q = q * jnp.float32(1.0 / temperature)               # scale Q once: O(Lq*D)
    outs = []
    for h in range(head_num):
        lo, hi = h * head_dim, (h + 1) * head_dim
        qh, kh, vh = q[:, lo:hi], k[:, lo:hi], v[:, lo:hi]
        s = jnp.dot(qh, kh.T, preferred_element_type=jnp.float32)   # (Lq, Lk)
        if has_mask:
            s = s + m
        s = s - jnp.max(s, axis=-1, keepdims=True)
        p = jnp.exp(s)
        denom = jnp.sum(p, axis=-1, keepdims=True)
        oh = jnp.dot(p, vh, preferred_element_type=jnp.float32)     # (Lq, Dh)
        outs.append(oh * pl.reciprocal(denom, approx=True))         # EUP, O(Lq*Dh)
    o_ref[0] = jnp.concatenate(outs, axis=-1)            # full-width (lane-dense) write
    # TODO(synk): for very long sequences (L >~ 2k) tile the key axis with an online
    # softmax (flash-style) to bound VMEM; not needed for this decoder (max_len=500).


def self_attention(qkv, add_mask, temperature, head_num):
    """qkv: (B, Lq, 3D) packed, add_mask: (B, Lq, Lq) additive -> (B, Lq, D)."""
    B, Lq, threeD = qkv.shape
    D = threeD // 3
    head_dim = D // head_num
    return pl.pallas_call(
        partial(_mha_kernel, head_num=head_num, head_dim=head_dim,
                temperature=temperature, fused_qkv=True, has_mask=True),
        grid=(B,),
        out_shape=jax.ShapeDtypeStruct((B, Lq, D), jnp.float32),
        in_specs=[pl.BlockSpec((1, Lq, threeD), lambda b: (b, 0, 0)),
                  pl.BlockSpec((1, Lq, Lq), lambda b: (b, 0, 0))],
        out_specs=pl.BlockSpec((1, Lq, D), lambda b: (b, 0, 0)),
        compiler_params=pltpu.CompilerParams(dimension_semantics=("parallel",)),
    )(qkv, add_mask)


def cross_attention(q, kv, temperature, head_num):
    """q: (B, Lq, D), kv: (B, Lk, 2D) packed; reference passes no mask -> skip it."""
    B, Lq, D = q.shape
    Lk = kv.shape[1]
    head_dim = D // head_num
    return pl.pallas_call(
        partial(_mha_kernel, head_num=head_num, head_dim=head_dim,
                temperature=temperature, fused_qkv=False, has_mask=False),
        grid=(B,),
        out_shape=jax.ShapeDtypeStruct((B, Lq, D), jnp.float32),
        in_specs=[pl.BlockSpec((1, Lq, D), lambda b: (b, 0, 0)),
                  pl.BlockSpec((1, Lk, 2 * D), lambda b: (b, 0, 0))],
        out_specs=pl.BlockSpec((1, Lq, D), lambda b: (b, 0, 0)),
        compiler_params=pltpu.CompilerParams(dimension_semantics=("parallel",)),
    )(q, kv)


# ------------------------------- model pieces -------------------------------

def self_attention_block(x, lp, add_mask, head_num):
    B, L, D = x.shape
    x2d = x.reshape(B * L, D)
    qkv = linear(x2d, lp['wqkv'], lp['bqkv']).reshape(B, L, 3 * D)  # fused Q|K|V
    att = self_attention(qkv, add_mask, float(math.sqrt(D)), head_num)
    out = proj_add_layernorm(att.reshape(B * L, D), lp['wo'], lp['bo'],
                             x2d, lp['ln_g'], lp['ln_b'])
    return out.reshape(B, L, D)


def cross_attention_block(x, src, lp, head_num):
    B, L, D = x.shape
    _, S, C = src.shape
    x2d = x.reshape(B * L, D)
    src2d = src.reshape(B * S, C)
    q = linear(x2d, lp['wq'], lp['bq']).reshape(B, L, D)
    kv = linear(src2d, lp['wkv'], lp['bkv']).reshape(B, S, 2 * D)   # fused K|V
    att = cross_attention(q, kv, float(math.sqrt(D)), head_num)
    out = proj_add_layernorm(att.reshape(B * L, D), lp['wo'], lp['bo'],
                             x2d, lp['ln_g'], lp['ln_b'])
    return out.reshape(B, L, D)


def decoder_layer(tgt, src, lp, self_add_mask, head_num):
    out = self_attention_block(tgt, lp['self'], self_add_mask, head_num)
    out = cross_attention_block(out, src, lp['cross'], head_num)
    B, L, D = out.shape
    out = ffn_add_layernorm(out.reshape(B * L, D),
                            lp['ff_w1'], lp['ff_b1'], lp['ff_w2'], lp['ff_b2'],
                            lp['ln3_g'], lp['ln3_b']).reshape(B, L, D)
    return out


def generator(x2d, w, b, num_classes):
    # pad the output width to a lane-dense multiple of 128; slice outside the kernel
    N = w.shape[1]
    Np = _round_up(N, 128)
    if Np != N:
        w = jnp.pad(w, ((0, 0), (0, Np - N)))
        b = jnp.pad(b, ((0, 0), (0, Np - N)))
    y = linear(x2d, w, b)
    return y[:, :num_classes]


def position_encoding(d, max_len=500):
    pos = jnp.arange(max_len, dtype=jnp.float32)[:, None]
    i = jnp.arange(d, dtype=jnp.float32)[None, :]
    angle_rates = 1.0 / jnp.power(10000.0, 2.0 * jnp.floor(i / 2.0) / d)
    pe = pos * angle_rates
    pe = pe.at[:, 0::2].set(jnp.sin(pe[:, 0::2]))
    pe = pe.at[:, 1::2].set(jnp.cos(pe[:, 1::2]))
    return pe


def transformer_decoder_forward(src, text, params, *, head_num, pad_id):
    """Training path (is_train=True, teacher_forcing_ratio=1.0); dropout = identity."""
    # TODO(synk): dropout layers run in eval semantics (identity); the stochastic
    # training dropout and the autoregressive/beam-search inference path (Python
    # control flow with data-dependent lengths) are not translated.
    B, L = text.shape
    D = params['embedding'].shape[1]

    # text_embedding * sqrt(D) + positional encoding
    tgt = params['embedding'][text] * math.sqrt(D)
    tgt = tgt + params['pos_enc'][None, :L, :]

    # pad_mask | order_mask  ->  additive mask (masked positions get -1e30)
    pad_mask = (text == pad_id)
    pad_mask = pad_mask.at[:, 0].set(False)
    order_mask = jnp.triu(jnp.ones((L, L), dtype=bool), k=1)
    mask = pad_mask[:, None, :] | order_mask[None, :, :]                # (B, L, L)
    self_add_mask = jnp.where(mask, -1e30, 0.0).astype(jnp.float32)

    for lp in params['layers']:
        tgt = decoder_layer(tgt, src, lp, self_add_mask, head_num)

    num_classes = params['gen_w'].shape[1]
    logits = generator(tgt.reshape(B * L, D), params['gen_w'], params['gen_b'],
                       num_classes)
    return logits.reshape(B, L, num_classes)


# -------------------------------- param init --------------------------------

def _init_linear(key, in_dim, out_dim):
    kw, kb = jax.random.split(key)
    w = jax.random.normal(kw, (in_dim, out_dim), jnp.float32) * 0.02
    b = jax.random.normal(kb, (1, out_dim), jnp.float32) * 0.02
    return w, b


def init_params(key, *, num_classes, src_dim, hidden_dim, filter_dim, layer_num):
    keys = jax.random.split(key, 2 + layer_num)
    params = {}
    params['embedding'] = jax.random.normal(
        keys[0], (num_classes + 1, hidden_dim), jnp.float32) * 0.02
    params['pos_enc'] = position_encoding(hidden_dim)
    params['gen_w'], params['gen_b'] = _init_linear(keys[1], hidden_dim, num_classes)

    layers = []
    for li in range(layer_num):
        lk = jax.random.split(keys[2 + li], 8)
        D = hidden_dim

        # self-attention: fused Q|K|V weight
        wq, bq = _init_linear(lk[0], D, D)
        wk, bk = _init_linear(lk[1], D, D)
        wv, bv = _init_linear(lk[2], D, D)
        wo, bo = _init_linear(lk[3], D, D)
        self_p = dict(wqkv=jnp.concatenate([wq, wk, wv], axis=1),
                      bqkv=jnp.concatenate([bq, bk, bv], axis=1),
                      wo=wo, bo=bo,
                      ln_g=jnp.ones((1, D), jnp.float32),
                      ln_b=jnp.zeros((1, D), jnp.float32))

        # cross-attention: separate Q, fused K|V (different input dims)
        cwq, cbq = _init_linear(lk[4], D, D)
        cwk, cbk = _init_linear(lk[5], src_dim, D)
        cwv, cbv = _init_linear(lk[6], src_dim, D)
        cwo, cbo = _init_linear(lk[7], D, D)
        cross_p = dict(wq=cwq, bq=cbq,
                       wkv=jnp.concatenate([cwk, cwv], axis=1),
                       bkv=jnp.concatenate([cbk, cbv], axis=1),
                       wo=cwo, bo=cbo,
                       ln_g=jnp.ones((1, D), jnp.float32),
                       ln_b=jnp.zeros((1, D), jnp.float32))

        fk = jax.random.split(lk[0], 2)
        ff_w1, ff_b1 = _init_linear(fk[0], D, filter_dim)
        ff_w2, ff_b2 = _init_linear(fk[1], filter_dim, D)

        layers.append(dict(self=self_p, cross=cross_p,
                           ff_w1=ff_w1, ff_b1=ff_b1, ff_w2=ff_w2, ff_b2=ff_b2,
                           ln3_g=jnp.ones((1, D), jnp.float32),
                           ln3_b=jnp.zeros((1, D), jnp.float32)))
    params['layers'] = layers
    return params


# ----------------------------------- main ------------------------------------

if __name__ == "__main__":
    # small shapes consistent with the module's forward
    batch = 2
    seq_len = 8          # target text length
    src_len = 16         # encoder feature length
    src_dim = 32
    hidden_dim = 32
    filter_dim = 64
    head_num = 4
    num_classes = 10
    pad_id = 0
    layer_num = 2

    root = jax.random.PRNGKey(0)
    k_params, k_src, k_text = jax.random.split(root, 3)

    params = init_params(
        k_params, num_classes=num_classes, src_dim=src_dim,
        hidden_dim=hidden_dim, filter_dim=filter_dim, layer_num=layer_num)

    src = jax.random.normal(k_src, (batch, src_len, src_dim), jnp.float32)
    text = jax.random.randint(k_text, (batch, seq_len), 0, num_classes + 1)

    fwd = jax.jit(partial(transformer_decoder_forward,
                          head_num=head_num, pad_id=pad_id))
    out = fwd(src, text, params)
    out = jax.block_until_ready(out)

    assert out.shape == (batch, seq_len, num_classes), out.shape
    assert bool(jnp.all(jnp.isfinite(out)))
    print("KERNEL_OK")
</pallas_src>

<mosaic_0001>
module attributes {stable_mosaic.version = 11 : i64} {
  func.func @_linear_kernel(%arg0: i32, %arg1: i32, %arg2: i32, %arg3: memref<16x32xf32, #tpu.memory_space<vmem>>, %arg4: memref<32x96xf32, #tpu.memory_space<vmem>>, %arg5: memref<1x96xf32, #tpu.memory_space<vmem>>, %arg6: memref<16x96xf32, #tpu.memory_space<vmem>>, %arg7: memref<16x96xf32, #tpu.memory_space<vmem>>) attributes {dimension_semantics = [#tpu.dimension_semantics<parallel>, #tpu.dimension_semantics<parallel>, #tpu.dimension_semantics<arbitrary>], iteration_bounds = array<i64: 1, 1, 1>, scalar_prefetch = 0 : i64, scratch_operands = 1 : i64, tpu.core_type = #tpu.core_type<tc>, window_params = [{transform_indices = @transform_0, window_bounds = array<i64: 16, 32>}, {transform_indices = @transform_1, window_bounds = array<i64: 32, 96>}, {transform_indices = @transform_2, window_bounds = array<i64: 1, 96>}, {transform_indices = @transform_3, window_bounds = array<i64: 16, 96>}]} {
    %c0_i32 = arith.constant 0 : i32
    %0 = arith.cmpi eq, %arg2, %c0_i32 : i32
    %1 = arith.extui %0 : i1 to i32
    %c0_i32_0 = arith.constant 0 : i32
    %2 = arith.cmpi ne, %1, %c0_i32_0 : i32
    scf.if %2 {
      %c0_10 = arith.constant 0 : index
      %c0_11 = arith.constant 0 : index
      %12 = vector.load %arg5[%c0_10, %c0_11] : memref<1x96xf32, #tpu.memory_space<vmem>>, vector<1x96xf32>
      %13 = vector.shape_cast %12 : vector<1x96xf32> to vector<1x96xf32>
      %14 = vector.broadcast %13 : vector<1x96xf32> to vector<16x96xf32>
      %c0_12 = arith.constant 0 : index
      %c0_13 = arith.constant 0 : index
      %15 = vector.load %arg7[%c0_12, %c0_13] : memref<16x96xf32, #tpu.memory_space<vmem>>, vector<16x96xf32>
      tpu.vector_store %arg7[%c0_12, %c0_13], %14 {strides = array<i32>} : memref<16x96xf32, #tpu.memory_space<vmem>>, vector<16x96xf32>,
    } else {
    }
    %c0 = arith.constant 0 : index
    %c0_1 = arith.constant 0 : index
    %3 = vector.load %arg7[%c0, %c0_1] : memref<16x96xf32, #tpu.memory_space<vmem>>, vector<16x96xf32>
    %c0_2 = arith.constant 0 : index
    %c0_3 = arith.constant 0 : index
    %4 = vector.load %arg3[%c0_2, %c0_3] : memref<16x32xf32, #tpu.memory_space<vmem>>, vector<16x32xf32>
    %c0_4 = arith.constant 0 : index
    %c0_5 = arith.constant 0 : index
    %5 = vector.load %arg4[%c0_4, %c0_5] : memref<32x96xf32, #tpu.memory_space<vmem>>, vector<32x96xf32>
    %cst = arith.constant dense<0.000000e+00> : vector<16x96xf32>
    %6 = tpu.matmul %4, %5, %cst {dimension_numbers = #tpu.dot_dimension_numbers<[1], [0], [0], [1], [0, 0, 1, 1], [], []>} : vector<16x32xf32>, vector<32x96xf32>, vector<16x96xf32> -> vector<16x96xf32>
    %7 = arith.addf %3, %6 : vector<16x96xf32>
    %c0_6 = arith.constant 0 : index
    %c0_7 = arith.constant 0 : index
    %8 = vector.load %arg7[%c0_6, %c0_7] : memref<16x96xf32, #tpu.memory_space<vmem>>, vector<16x96xf32>
    tpu.vector_store %arg7[%c0_6, %c0_7], %7 {strides = array<i32>} : memref<16x96xf32, #tpu.memory_space<vmem>>, vector<16x96xf32>,
    %c0_i32_8 = arith.constant 0 : i32
    %9 = arith.cmpi eq, %arg2, %c0_i32_8 : i32
    %10 = arith.extui %9 : i1 to i32
    %c0_i32_9 = arith.constant 0 : i32
    %11 = arith.cmpi ne, %10, %c0_i32_9 : i32
    scf.if %11 {
      %c0_10 = arith.constant 0 : index
      %c0_11 = arith.constant 0 : index
      %12 = vector.load %arg7[%c0_10, %c0_11] : memref<16x96xf32, #tpu.memory_space<vmem>>, vector<16x96xf32>
      %c0_12 = arith.constant 0 : index
      %c0_13 = arith.constant 0 : index
      %13 = vector.load %arg6[%c0_12, %c0_13] : memref<16x96xf32, #tpu.memory_space<vmem>>, vector<16x96xf32>
      tpu.vector_store %arg6[%c0_12, %c0_13], %12 {strides = array<i32>} : memref<16x96xf32, #tpu.memory_space<vmem>>, vector<16x96xf32>,
    } else {
    }
    return
  }
  func.func @transform_0(%arg0: i32, %arg1: i32, %arg2: i32) -> (i32, i32) {
    %c0_i32 = arith.constant 0 : i32
    return %arg0, %arg2 : i32, i32
  }
  func.func @transform_1(%arg0: i32, %arg1: i32, %arg2: i32) -> (i32, i32) {
    %c0_i32 = arith.constant 0 : i32
    return %arg2, %arg1 : i32, i32
  }
  func.func @transform_2(%arg0: i32, %arg1: i32, %arg2: i32) -> (i32, i32) {
    %c0_i32 = arith.constant 0 : i32
    %c0_i32_0 = arith.constant 0 : i32
    return %c0_i32, %arg1 : i32, i32
  }
  func.func @transform_3(%arg0: i32, %arg1: i32, %arg2: i32) -> (i32, i32) {
    %c0_i32 = arith.constant 0 : i32
    return %arg0, %arg1 : i32, i32
  }
}

module attributes {stable_mosaic.version = 11 : i64} {
  func.func @_mha_kernel(%arg0: i32, %arg1: memref<1x8x96xf32, #tpu.memory_space<vmem>>, %arg2: memref<1x8x8xf32, #tpu.memory_space<vmem>>, %arg3: memref<1x8x32xf32, #tpu.memory_space<vmem>>) attributes {dimension_semantics = [#tpu.dimension_semantics<parallel>], iteration_bounds = array<i64: 2>, scalar_prefetch = 0 : i64, scratch_operands = 0 : i64, tpu.core_type = #tpu.core_type<tc>, window_params = [{transform_indices = @transform_0, window_bounds = array<i64: 1, 8, 96>}, {transform_indices = @transform_1, window_bounds = array<i64: 1, 8, 8>}, {transform_indices = @transform_2, window_bounds = array<i64: 1, 8, 32>}]} {
    %c0 = arith.constant 0 : index
    %c0_0 = arith.constant 0 : index
    %c0_1 = arith.constant 0 : index
    %0 = vector.load %arg1[%c0, %c0_0, %c0_1] : memref<1x8x96xf32, #tpu.memory_space<vmem>>, vector<1x8x96xf32>
    %1 = vector.shape_cast %0 : vector<1x8x96xf32> to vector<8x96xf32>
    %2 = vector.extract_strided_slice %1 {offsets = [0, 0], sizes = [8, 32], strides = [1, 1]} : vector<8x96xf32> to vector<8x32xf32>
    %3 = vector.extract_strided_slice %1 {offsets = [0, 32], sizes = [8, 32], strides = [1, 1]} : vector<8x96xf32> to vector<8x32xf32>
    %4 = vector.extract_strided_slice %1 {offsets = [0, 64], sizes = [8, 32], strides = [1, 1]} : vector<8x96xf32> to vector<8x32xf32>
    %c0_2 = arith.constant 0 : index
    %c0_3 = arith.constant 0 : index
    %c0_4 = arith.constant 0 : index
    %5 = vector.load %arg2[%c0_2, %c0_3, %c0_4] : memref<1x8x8xf32, #tpu.memory_space<vmem>>, vector<1x8x8xf32>
    %6 = vector.shape_cast %5 : vector<1x8x8xf32> to vector<8x8xf32>
    %cst = arith.constant 0.176776692 : f32
    %7 = vector.broadcast %cst : f32 to vector<8x32xf32>
    %8 = arith.mulf %2, %7 : vector<8x32xf32>
    %9 = vector.extract_strided_slice %8 {offsets = [0, 0], sizes = [8, 8], strides = [1, 1]} : vector<8x32xf32> to vector<8x8xf32>
    %10 = vector.extract_strided_slice %3 {offsets = [0, 0], sizes = [8, 8], strides = [1, 1]} : vector<8x32xf32> to vector<8x8xf32>
    %11 = vector.extract_strided_slice %4 {offsets = [0, 0], sizes = [8, 8], strides = [1, 1]} : vector<8x32xf32> to vector<8x8xf32>
    %12 = tpu.transpose %10, [1, 0] : vector<8x8xf32> -> vector<8x8xf32>
    %cst_5 = arith.constant dense<0.000000e+00> : vector<8x8xf32>
    %13 = tpu.matmul %9, %12, %cst_5 {dimension_numbers = #tpu.dot_dimension_numbers<[1], [0], [0], [1], [0, 0, 1, 1], [], []>} : vector<8x8xf32>, vector<8x8xf32>, vector<8x8xf32> -> vector<8x8xf32>
    %14 = arith.addf %13, %6 : vector<8x8xf32>
    %cst_6 = arith.constant dense<0xFF800000> : vector<8xf32>
    %15 = vector.multi_reduction <maximumf>, %14, %cst_6 [1] : vector<8x8xf32> to vector<8xf32>
    %16 = vector.shape_cast %15 : vector<8xf32> to vector<8x1xf32>
    %17 = vector.broadcast %16 : vector<8x1xf32> to vector<8x8xf32>
    %18 = arith.subf %14, %17 : vector<8x8xf32>
    %19 = math.exp %18 : vector<8x8xf32>
    %cst_7 = arith.constant dense<0.000000e+00> : vector<8xf32>
    %20 = vector.multi_reduction <add>, %19, %cst_7 [1] : vector<8x8xf32> to vector<8xf32>
    %21 = vector.shape_cast %20 : vector<8xf32> to vector<8x1xf32>
    %cst_8 = arith.constant dense<0.000000e+00> : vector<8x8xf32>
    %22 = tpu.matmul %19, %11, %cst_8 {dimension_numbers = #tpu.dot_dimension_numbers<[1], [0], [0], [1], [0, 0, 1, 1], [], []>} : vector<8x8xf32>, vector<8x8xf32>, vector<8x8xf32> -> vector<8x8xf32>
    %23 = tpu.reciprocal %21 {approx = true} : vector<8x1xf32> -> vector<8x1xf32>
    %24 = vector.broadcast %23 : vector<8x1xf32> to vector<8x8xf32>
    %25 = arith.mulf %22, %24 : vector<8x8xf32>
    %26 = vector.extract_strided_slice %8 {offsets = [0, 8], sizes = [8, 8], strides = [1, 1]} : vector<8x32xf32> to vector<8x8xf32>
    %27 = vector.extract_strided_slice %3 {offsets = [0, 8], sizes = [8, 8], strides = [1, 1]} : vector<8x32xf32> to vector<8x8xf32>
    %28 = vector.extract_strided_slice %4 {offsets = [0, 8], sizes = [8, 8], strides = [1, 1]} : vector<8x32xf32> to vector<8x8xf32>
    %29 = tpu.transpose %27, [1, 0] : vector<8x8xf32> -> vector<8x8xf32>
    %cst_9 = arith.constant dense<0.000000e+00> : vector<8x8xf32>
    %30 = tpu.matmul %26, %29, %cst_9 {dimension_numbers = #tpu.dot_dimension_numbers<[1], [0], [0], [1], [0, 0, 1, 1], [], []>} : vector<8x8xf32>, vector<8x8xf32>, vector<8x8xf32> -> vector<8x8xf32>
    %31 = arith.addf %30, %6 : vector<8x8xf32>
    %cst_10 = arith.constant dense<0xFF800000> : vector<8xf32>
    %32 = vector.multi_reduction <maximumf>, %31, %cst_10 [1] : vector<8x8xf32> to vector<8xf32>
    %33 = vector.shape_cast %32 : vector<8xf32> to vector<8x1xf32>
    %34 = vector.broadcast %33 : vector<8x1xf32> to vector<8x8xf32>
    %35 = arith.subf %31, %34 : vector<8x8xf32>
    %36 = math.exp %35 : vector<8x8xf32>
    %cst_11 = arith.constant dense<0.000000e+00> : vector<8xf32>
    %37 = vector.multi_reduction <add>, %36, %cst_11 [1] : vector<8x8xf32> to vector<8xf32>
    %38 = vector.shape_cast %37 : vector<8xf32> to vector<8x1xf32>
    %cst_12 = arith.constant dense<0.000000e+00> : vector<8x8xf32>
    %39 = tpu.matmul %36, %28, %cst_12 {dimension_numbers = #tpu.dot_dimension_numbers<[1], [0], [0], [1], [0, 0, 1, 1], [], []>} : vector<8x8xf32>, vector<8x8xf32>, vector<8x8xf32> -> vector<8x8xf32>
    %40 = tpu.reciprocal %38 {approx = true} : vector<8x1xf32> -> vector<8x1xf32>
    %41 = vector.broadcast %40 : vector<8x1xf32> to vector<8x8xf32>
    %42 = arith.mulf %39, %41 : vector<8x8xf32>
    %43 = vector.extract_strided_slice %8 {offsets = [0, 16], sizes = [8, 8], strides = [1, 1]} : vector<8x32xf32> to vector<8x8xf32>
    %44 = vector.extract_strided_slice %3 {offsets = [0, 16], sizes = [8, 8], strides = [1, 1]} : vector<8x32xf32> to vector<8x8xf32>
    %45 = vector.extract_strided_slice %4 {offsets = [0, 16], sizes = [8, 8], strides = [1, 1]} : vector<8x32xf32> to vector<8x8xf32>
    %46 = tpu.transpose %44, [1, 0] : vector<8x8xf32> -> vector<8x8xf32>
    %cst_13 = arith.constant dense<0.000000e+00> : vector<8x8xf32>
    %47 = tpu.matmul %43, %46, %cst_13 {dimension_numbers = #tpu.dot_dimension_numbers<[1], [0], [0], [1], [0, 0, 1, 1], [], []>} : vector<8x8xf32>, vector<8x8xf32>, vector<8x8xf32> -> vector<8x8xf32>
    %48 = arith.addf %47, %6 : vector<8x8xf32>
    %cst_14 = arith.constant dense<0xFF800000> : vector<8xf32>
    %49 = vector.multi_reduction <maximumf>, %48, %cst_14 [1] : vector<8x8xf32> to vector<8xf32>
    %50 = vector.shape_cast %49 : vector<8xf32> to vector<8x1xf32>
    %51 = vector.broadcast %50 : vector<8x1xf32> to vector<8x8xf32>
    %52 = arith.subf %48, %51 : vector<8x8xf32>
    %53 = math.exp %52 : vector<8x8xf32>
    %cst_15 = arith.constant dense<0.000000e+00> : vector<8xf32>
    %54 = vector.multi_reduction <add>, %53, %cst_15 [1] : vector<8x8xf32> to vector<8xf32>
    %55 = vector.shape_cast %54 : vector<8xf32> to vector<8x1xf32>
    %cst_16 = arith.constant dense<0.000000e+00> : vector<8x8xf32>
    %56 = tpu.matmul %53, %45, %cst_16 {dimension_numbers = #tpu.dot_dimension_numbers<[1], [0], [0], [1], [0, 0, 1, 1], [], []>} : vector<8x8xf32>, vector<8x8xf32>, vector<8x8xf32> -> vector<8x8xf32>
    %57 = tpu.reciprocal %55 {approx = true} : vector<8x1xf32> -> vector<8x1xf32>
    %58 = vector.broadcast %57 : vector<8x1xf32> to vector<8x8xf32>
    %59 = arith.mulf %56, %58 : vector<8x8xf32>
    %60 = vector.extract_strided_slice %8 {offsets = [0, 24], sizes = [8, 8], strides = [1, 1]} : vector<8x32xf32> to vector<8x8xf32>
    %61 = vector.extract_strided_slice %3 {offsets = [0, 24], sizes = [8, 8], strides = [1, 1]} : vector<8x32xf32> to vector<8x8xf32>
    %62 = vector.extract_strided_slice %4 {offsets = [0, 24], sizes = [8, 8], strides = [1, 1]} : vector<8x32xf32> to vector<8x8xf32>
    %63 = tpu.transpose %61, [1, 0] : vector<8x8xf32> -> vector<8x8xf32>
    %cst_17 = arith.constant dense<0.000000e+00> : vector<8x8xf32>
    %64 = tpu.matmul %60, %63, %cst_17 {dimension_numbers = #tpu.dot_dimension_numbers<[1], [0], [0], [1], [0, 0, 1, 1], [], []>} : vector<8x8xf32>, vector<8x8xf32>, vector<8x8xf32> -> vector<8x8xf32>
    %65 = arith.addf %64, %6 : vector<8x8xf32>
    %cst_18 = arith.constant dense<0xFF800000> : vector<8xf32>
    %66 = vector.multi_reduction <maximumf>, %65, %cst_18 [1] : vector<8x8xf32> to vector<8xf32>
    %67 = vector.shape_cast %66 : vector<8xf32> to vector<8x1xf32>
    %68 = vector.broadcast %67 : vector<8x1xf32> to vector<8x8xf32>
    %69 = arith.subf %65, %68 : vector<8x8xf32>
    %70 = math.exp %69 : vector<8x8xf32>
    %cst_19 = arith.constant dense<0.000000e+00> : vector<8xf32>
    %71 = vector.multi_reduction <add>, %70, %cst_19 [1] : vector<8x8xf32> to vector<8xf32>
    %72 = vector.shape_cast %71 : vector<8xf32> to vector<8x1xf32>
    %cst_20 = arith.constant dense<0.000000e+00> : vector<8x8xf32>
    %73 = tpu.matmul %70, %62, %cst_20 {dimension_numbers = #tpu.dot_dimension_numbers<[1], [0], [0], [1], [0, 0, 1, 1], [], []>} : vector<8x8xf32>, vector<8x8xf32>, vector<8x8xf32> -> vector<8x8xf32>
    %74 = tpu.reciprocal %72 {approx = true} : vector<8x1xf32> -> vector<8x1xf32>
    %75 = vector.broadcast %74 : vector<8x1xf32> to vector<8x8xf32>
    %76 = arith.mulf %73, %75 : vector<8x8xf32>
    %77 = tpu.concatenate %25, %42, %59, %76 in 1 : vector<8x8xf32>, vector<8x8xf32>, vector<8x8xf32>, vector<8x8xf32> -> vector<8x32xf32>
    %c0_21 = arith.constant 0 : index
    %c0_22 = arith.constant 0 : index
    %c0_23 = arith.constant 0 : index
    %78 = vector.load %arg3[%c0_21, %c0_22, %c0_23] : memref<1x8x32xf32, #tpu.memory_space<vmem>>, vector<1x8x32xf32>
    %79 = vector.shape_cast %78 : vector<1x8x32xf32> to vector<8x32xf32>
    %80 = vector.shape_cast %77 : vector<8x32xf32> to vector<1x8x32xf32>
    tpu.vector_store %arg3[%c0_21, %c0_22, %c0_23], %80 {strides = array<i32>} : memref<1x8x32xf32, #tpu.memory_space<vmem>>, vector<1x8x32xf32>,
    return
  }
  func.func @transform_0(%arg0: i32) -> (i32, i32, i32) {
    %c0_i32 = arith.constant 0 : i32
    %c0_i32_0 = arith.constant 0 : i32
    %c0_i32_1 = arith.constant 0 : i32
    return %arg0, %c0_i32, %c0_i32_0 : i32, i32, i32
  }
  func.func @transform_1(%arg0: i32) -> (i32, i32, i32) {
    %c0_i32 = arith.constant 0 : i32
    %c0_i32_0 = arith.constant 0 : i32
    %c0_i32_1 = arith.constant 0 : i32
    return %arg0, %c0_i32, %c0_i32_0 : i32, i32, i32
  }
  func.func @transform_2(%arg0: i32) -> (i32, i32, i32) {
    %c0_i32 = arith.constant 0 : i32
    %c0_i32_0 = arith.constant 0 : i32
    %c0_i32_1 = arith.constant 0 : i32
    return %arg0, %c0_i32, %c0_i32_0 : i32, i32, i32
  }
}

module attributes {stable_mosaic.version = 11 : i64} {
  func.func @_proj_add_ln_kernel(%arg0: i32, %arg1: memref<16x32xf32, #tpu.memory_space<vmem>>, %arg2: memref<32x32xf32, #tpu.memory_space<vmem>>, %arg3: memref<1x32xf32, #tpu.memory_space<vmem>>, %arg4: memref<16x32xf32, #tpu.memory_space<vmem>>, %arg5: memref<1x32xf32, #tpu.memory_space<vmem>>, %arg6: memref<1x32xf32, #tpu.memory_space<vmem>>, %arg7: memref<16x32xf32, #tpu.memory_space<vmem>>) attributes {dimension_semantics = [#tpu.dimension_semantics<parallel>], iteration_bounds = array<i64: 1>, scalar_prefetch = 0 : i64, scratch_operands = 0 : i64, tpu.core_type = #tpu.core_type<tc>, window_params = [{transform_indices = @transform_0, window_bounds = array<i64: 16, 32>}, {pipeline_mode = #tpu.pipeline_mode<synchronous>, transform_indices = @transform_1, window_bounds = array<i64: 32, 32>}, {pipeline_mode = #tpu.pipeline_mode<synchronous>, transform_indices = @transform_2, window_bounds = array<i64: 1, 32>}, {transform_indices = @transform_3, window_bounds = array<i64: 16, 32>}, {pipeline_mode = #tpu.pipeline_mode<synchronous>, transform_indices = @transform_4, window_bounds = array<i64: 1, 32>}, {pipeline_mode = #tpu.pipeline_mode<synchronous>, transform_indices = @transform_5, window_bounds = array<i64: 1, 32>}, {transform_indices = @transform_6, window_bounds = array<i64: 16, 32>}]} {
    %c0 = arith.constant 0 : index
    %c0_0 = arith.constant 0 : index
    %0 = vector.load %arg1[%c0, %c0_0] : memref<16x32xf32, #tpu.memory_space<vmem>>, vector<16x32xf32>
    %c0_1 = arith.constant 0 : index
    %c0_2 = arith.constant 0 : index
    %1 = vector.load %arg2[%c0_1, %c0_2] : memref<32x32xf32, #tpu.memory_space<vmem>>, vector<32x32xf32>
    %cst = arith.constant dense<0.000000e+00> : vector<16x32xf32>
    %2 = tpu.matmul %0, %1, %cst {dimension_numbers = #tpu.dot_dimension_numbers<[1], [0], [0], [1], [0, 0, 1, 1], [], []>} : vector<16x32xf32>, vector<32x32xf32>, vector<16x32xf32> -> vector<16x32xf32>
    %c0_3 = arith.constant 0 : index
    %c0_4 = arith.constant 0 : index
    %3 = vector.load %arg3[%c0_3, %c0_4] : memref<1x32xf32, #tpu.memory_space<vmem>>, vector<1x32xf32>
    %4 = vector.broadcast %3 : vector<1x32xf32> to vector<16x32xf32>
    %5 = arith.addf %2, %4 : vector<16x32xf32>
    %c0_5 = arith.constant 0 : index
    %c0_6 = arith.constant 0 : index
    %6 = vector.load %arg4[%c0_5, %c0_6] : memref<16x32xf32, #tpu.memory_space<vmem>>, vector<16x32xf32>
    %7 = arith.addf %5, %6 : vector<16x32xf32>
    %cst_7 = arith.constant dense<0.000000e+00> : vector<16xf32>
    %8 = vector.multi_reduction <add>, %7, %cst_7 [1] : vector<16x32xf32> to vector<16xf32>
    %9 = vector.shape_cast %8 : vector<16xf32> to vector<16x1xf32>
    %cst_8 = arith.constant 3.200000e+01 : f32
    %10 = vector.broadcast %cst_8 : f32 to vector<16x1xf32>
    %11 = arith.divf %9, %10 : vector<16x1xf32>
    %12 = vector.broadcast %11 : vector<16x1xf32> to vector<16x32xf32>
    %13 = arith.subf %7, %12 : vector<16x32xf32>
    %14 = arith.mulf %13, %13 : vector<16x32xf32>
    %cst_9 = arith.constant dense<0.000000e+00> : vector<16xf32>
    %15 = vector.multi_reduction <add>, %14, %cst_9 [1] : vector<16x32xf32> to vector<16xf32>
    %16 = vector.shape_cast %15 : vector<16xf32> to vector<16x1xf32>
    %cst_10 = arith.constant 3.200000e+01 : f32
    %17 = vector.broadcast %cst_10 : f32 to vector<16x1xf32>
    %18 = arith.divf %16, %17 : vector<16x1xf32>
    %19 = vector.broadcast %11 : vector<16x1xf32> to vector<16x32xf32>
    %20 = arith.subf %7, %19 : vector<16x32xf32>
    %cst_11 = arith.constant 9.99999974E-6 : f32
    %21 = vector.broadcast %cst_11 : f32 to vector<16x1xf32>
    %22 = arith.addf %18, %21 : vector<16x1xf32>
    %23 = math.rsqrt %22 : vector<16x1xf32>
    %24 = vector.broadcast %23 : vector<16x1xf32> to vector<16x32xf32>
    %25 = arith.mulf %20, %24 : vector<16x32xf32>
    %c0_12 = arith.constant 0 : index
    %c0_13 = arith.constant 0 : index
    %26 = vector.load %arg5[%c0_12, %c0_13] : memref<1x32xf32, #tpu.memory_space<vmem>>, vector<1x32xf32>
    %27 = vector.broadcast %26 : vector<1x32xf32> to vector<16x32xf32>
    %28 = arith.mulf %25, %27 : vector<16x32xf32>
    %c0_14 = arith.constant 0 : index
    %c0_15 = arith.constant 0 : index
    %29 = vector.load %arg6[%c0_14, %c0_15] : memref<1x32xf32, #tpu.memory_space<vmem>>, vector<1x32xf32>
    %30 = vector.broadcast %29 : vector<1x32xf32> to vector<16x32xf32>
    %31 = arith.addf %28, %30 : vector<16x32xf32>
    %c0_16 = arith.constant 0 : index
    %c0_17 = arith.constant 0 : index
    %32 = vector.load %arg7[%c0_16, %c0_17] : memref<16x32xf32, #tpu.memory_space<vmem>>, vector<16x32xf32>
    tpu.vector_store %arg7[%c0_16, %c0_17], %31 {strides = array<i32>} : memref<16x32xf32, #tpu.memory_space<vmem>>, vector<16x32xf32>,
    return
  }
  func.func @transform_0(%arg0: i32) -> (i32, i32) {
    %c0_i32 = arith.constant 0 : i32
    %c0_i32_0 = arith.constant 0 : i32
    return %arg0, %c0_i32 : i32, i32
  }
  func.func @transform_1(%arg0: i32) -> (i32, i32) {
    %c0_i32 = arith.constant 0 : i32
    %c0_i32_0 = arith.constant 0 : i32
    %c0_i32_1 = arith.constant 0 : i32
    return %c0_i32, %c0_i32_0 : i32, i32
  }
  func.func @transform_2(%arg0: i32) -> (i32, i32) {
    %c0_i32 = arith.constant 0 : i32
    %c0_i32_0 = arith.constant 0 : i32
    %c0_i32_1 = arith.constant 0 : i32
    return %c0_i32, %c0_i32_0 : i32, i32
  }
  func.func @transform_3(%arg0: i32) -> (i32, i32) {
    %c0_i32 = arith.constant 0 : i32
    %c0_i32_0 = arith.constant 0 : i32
    return %arg0, %c0_i32 : i32, i32
  }
  func.func @transform_4(%arg0: i32) -> (i32, i32) {
    %c0_i32 = arith.constant 0 : i32
    %c0_i32_0 = arith.constant 0 : i32
    %c0_i32_1 = arith.constant 0 : i32
    return %c0_i32, %c0_i32_0 : i32, i32
  }
  func.func @transform_5(%arg0: i32) -> (i32, i32) {
    %c0_i32 = arith.constant 0 : i32
    %c0_i32_0 = arith.constant 0 : i32
    %c0_i32_1 = arith.constant 0 : i32
    return %c0_i32, %c0_i32_0 : i32, i32
  }
  func.func @transform_6(%arg0: i32) -> (i32, i32) {
    %c0_i32 = arith.constant 0 : i32
    %c0_i32_0 = arith.constant 0 : i32
    return %arg0, %c0_i32 : i32, i32
  }
}

module attributes {stable_mosaic.version = 11 : i64} {
  func.func @_linear_kernel(%arg0: i32, %arg1: i32, %arg2: i32, %arg3: memref<16x32xf32, #tpu.memory_space<vmem>>, %arg4: memref<32x32xf32, #tpu.memory_space<vmem>>, %arg5: memref<1x32xf32, #tpu.memory_space<vmem>>, %arg6: memref<16x32xf32, #tpu.memory_space<vmem>>, %arg7: memref<16x32xf32, #tpu.memory_space<vmem>>) attributes {dimension_semantics = [#tpu.dimension_semantics<parallel>, #tpu.dimension_semantics<parallel>, #tpu.dimension_semantics<arbitrary>], iteration_bounds = array<i64: 1, 1, 1>, scalar_prefetch = 0 : i64, scratch_operands = 1 : i64, tpu.core_type = #tpu.core_type<tc>, window_params = [{transform_indices = @transform_0, window_bounds = array<i64: 16, 32>}, {transform_indices = @transform_1, window_bounds = array<i64: 32, 32>}, {transform_indices = @transform_2, window_bounds = array<i64: 1, 32>}, {transform_indices = @transform_3, window_bounds = array<i64: 16, 32>}]} {
    %c0_i32 = arith.constant 0 : i32
    %0 = arith.cmpi eq, %arg2, %c0_i32 : i32
    %1 = arith.extui %0 : i1 to i32
    %c0_i32_0 = arith.constant 0 : i32
    %2 = arith.cmpi ne, %1, %c0_i32_0 : i32
    scf.if %2 {
      %c0_10 = arith.constant 0 : index
      %c0_11 = arith.constant 0 : index
      %12 = vector.load %arg5[%c0_10, %c0_11] : memref<1x32xf32, #tpu.memory_space<vmem>>, vector<1x32xf32>
      %13 = vector.shape_cast %12 : vector<1x32xf32> to vector<1x32xf32>
      %14 = vector.broadcast %13 : vector<1x32xf32> to vector<16x32xf32>
      %c0_12 = arith.constant 0 : index
      %c0_13 = arith.constant 0 : index
      %15 = vector.load %arg7[%c0_12, %c0_13] : memref<16x32xf32, #tpu.memory_space<vmem>>, vector<16x32xf32>
      tpu.vector_store %arg7[%c0_12, %c0_13], %14 {strides = array<i32>} : memref<16x32xf32, #tpu.memory_space<vmem>>, vector<16x32xf32>,
    } else {
    }
    %c0 = arith.constant 0 : index
    %c0_1 = arith.constant 0 : index
    %3 = vector.load %arg7[%c0, %c0_1] : memref<16x32xf32, #tpu.memory_space<vmem>>, vector<16x32xf32>
    %c0_2 = arith.constant 0 : index
    %c0_3 = arith.constant 0 : index
    %4 = vector.load %arg3[%c0_2, %c0_3] : memref<16x32xf32, #tpu.memory_space<vmem>>, vector<16x32xf32>
    %c0_4 = arith.constant 0 : index
    %c0_5 = arith.constant 0 : index
    %5 = vector.load %arg4[%c0_4, %c0_5] : memref<32x32xf32, #tpu.memory_space<vmem>>, vector<32x32xf32>
    %cst = arith.constant dense<0.000000e+00> : vector<16x32xf32>
    %6 = tpu.matmul %4, %5, %cst {dimension_numbers = #tpu.dot_dimension_numbers<[1], [0], [0], [1], [0, 0, 1, 1], [], []>} : vector<16x32xf32>, vector<32x32xf32>, vector<16x32xf32> -> vector<16x32xf32>
    %7 = arith.addf %3, %6 : vector<16x32xf32>
    %c0_6 = arith.constant 0 : index
    %c0_7 = arith.constant 0 : index
    %8 = vector.load %arg7[%c0_6, %c0_7] : memref<16x32xf32, #tpu.memory_space<vmem>>, vector<16x32xf32>
    tpu.vector_store %arg7[%c0_6, %c0_7], %7 {strides = array<i32>} : memref<16x32xf32, #tpu.memory_space<vmem>>, vector<16x32xf32>,
    %c0_i32_8 = arith.constant 0 : i32
    %9 = arith.cmpi eq, %arg2, %c0_i32_8 : i32
    %10 = arith.extui %9 : i1 to i32
    %c0_i32_9 = arith.constant 0 : i32
    %11 = arith.cmpi ne, %10, %c0_i32_9 : i32
    scf.if %11 {
      %c0_10 = arith.constant 0 : index
      %c0_11 = arith.constant 0 : index
      %12 = vector.load %arg7[%c0_10, %c0_11] : memref<16x32xf32, #tpu.memory_space<vmem>>, vector<16x32xf32>
      %c0_12 = arith.constant 0 : index
      %c0_13 = arith.constant 0 : index
      %13 = vector.load %arg6[%c0_12, %c0_13] : memref<16x32xf32, #tpu.memory_space<vmem>>, vector<16x32xf32>
      tpu.vector_store %arg6[%c0_12, %c0_13], %12 {strides = array<i32>} : memref<16x32xf32, #tpu.memory_space<vmem>>, vector<16x32xf32>,
    } else {
    }
    return
  }
  func.func @transform_0(%arg0: i32, %arg1: i32, %arg2: i32) -> (i32, i32) {
    %c0_i32 = arith.constant 0 : i32
    return %arg0, %arg2 : i32, i32
  }
  func.func @transform_1(%arg0: i32, %arg1: i32, %arg2: i32) -> (i32, i32) {
    %c0_i32 = arith.constant 0 : i32
    return %arg2, %arg1 : i32, i32
  }
  func.func @transform_2(%arg0: i32, %arg1: i32, %arg2: i32) -> (i32, i32) {
    %c0_i32 = arith.constant 0 : i32
    %c0_i32_0 = arith.constant 0 : i32
    return %c0_i32, %arg1 : i32, i32
  }
  func.func @transform_3(%arg0: i32, %arg1: i32, %arg2: i32) -> (i32, i32) {
    %c0_i32 = arith.constant 0 : i32
    return %arg0, %arg1 : i32, i32
  }
}

module attributes {stable_mosaic.version = 11 : i64} {
  func.func @_linear_kernel(%arg0: i32, %arg1: i32, %arg2: i32, %arg3: memref<32x32xf32, #tpu.memory_space<vmem>>, %arg4: memref<32x64xf32, #tpu.memory_space<vmem>>, %arg5: memref<1x64xf32, #tpu.memory_space<vmem>>, %arg6: memref<32x64xf32, #tpu.memory_space<vmem>>, %arg7: memref<32x64xf32, #tpu.memory_space<vmem>>) attributes {dimension_semantics = [#tpu.dimension_semantics<parallel>, #tpu.dimension_semantics<parallel>, #tpu.dimension_semantics<arbitrary>], iteration_bounds = array<i64: 1, 1, 1>, scalar_prefetch = 0 : i64, scratch_operands = 1 : i64, tpu.core_type = #tpu.core_type<tc>, window_params = [{transform_indices = @transform_0, window_bounds = array<i64: 32, 32>}, {transform_indices = @transform_1, window_bounds = array<i64: 32, 64>}, {transform_indices = @transform_2, window_bounds = array<i64: 1, 64>}, {transform_indices = @transform_3, window_bounds = array<i64: 32, 64>}]} {
    %c0_i32 = arith.constant 0 : i32
    %0 = arith.cmpi eq, %arg2, %c0_i32 : i32
    %1 = arith.extui %0 : i1 to i32
    %c0_i32_0 = arith.constant 0 : i32
    %2 = arith.cmpi ne, %1, %c0_i32_0 : i32
    scf.if %2 {
      %c0_10 = arith.constant 0 : index
      %c0_11 = arith.constant 0 : index
      %12 = vector.load %arg5[%c0_10, %c0_11] : memref<1x64xf32, #tpu.memory_space<vmem>>, vector<1x64xf32>
      %13 = vector.shape_cast %12 : vector<1x64xf32> to vector<1x64xf32>
      %14 = vector.broadcast %13 : vector<1x64xf32> to vector<32x64xf32>
      %c0_12 = arith.constant 0 : index
      %c0_13 = arith.constant 0 : index
      %15 = vector.load %arg7[%c0_12, %c0_13] : memref<32x64xf32, #tpu.memory_space<vmem>>, vector<32x64xf32>
      tpu.vector_store %arg7[%c0_12, %c0_13], %14 {strides = array<i32>} : memref<32x64xf32, #tpu.memory_space<vmem>>, vector<32x64xf32>,
    } else {
    }
    %c0 = arith.constant 0 : index
    %c0_1 = arith.constant 0 : index
    %3 = vector.load %arg7[%c0, %c0_1] : memref<32x64xf32, #tpu.memory_space<vmem>>, vector<32x64xf32>
    %c0_2 = arith.constant 0 : index
    %c0_3 = arith.constant 0 : index
    %4 = vector.load %arg3[%c0_2, %c0_3] : memref<32x32xf32, #tpu.memory_space<vmem>>, vector<32x32xf32>
    %c0_4 = arith.constant 0 : index
    %c0_5 = arith.constant 0 : index
    %5 = vector.load %arg4[%c0_4, %c0_5] : memref<32x64xf32, #tpu.memory_space<vmem>>, vector<32x64xf32>
    %cst = arith.constant dense<0.000000e+00> : vector<32x64xf32>
    %6 = tpu.matmul %4, %5, %cst {dimension_numbers = #tpu.dot_dimension_numbers<[1], [0], [0], [1], [0, 0, 1, 1], [], []>} : vector<32x32xf32>, vector<32x64xf32>, vector<32x64xf32> -> vector<32x64xf32>
    %7 = arith.addf %3, %6 : vector<32x64xf32>
    %c0_6 = arith.constant 0 : index
    %c0_7 = arith.constant 0 : index
    %8 = vector.load %arg7[%c0_6, %c0_7] : memref<32x64xf32, #tpu.memory_space<vmem>>, vector<32x64xf32>
    tpu.vector_store %arg7[%c0_6, %c0_7], %7 {strides = array<i32>} : memref<32x64xf32, #tpu.memory_space<vmem>>, vector<32x64xf32>,
    %c0_i32_8 = arith.constant 0 : i32
    %9 = arith.cmpi eq, %arg2, %c0_i32_8 : i32
    %10 = arith.extui %9 : i1 to i32
    %c0_i32_9 = arith.constant 0 : i32
    %11 = arith.cmpi ne, %10, %c0_i32_9 : i32
    scf.if %11 {
      %c0_10 = arith.constant 0 : index
      %c0_11 = arith.constant 0 : index
      %12 = vector.load %arg7[%c0_10, %c0_11] : memref<32x64xf32, #tpu.memory_space<vmem>>, vector<32x64xf32>
      %c0_12 = arith.constant 0 : index
      %c0_13 = arith.constant 0 : index
      %13 = vector.load %arg6[%c0_12, %c0_13] : memref<32x64xf32, #tpu.memory_space<vmem>>, vector<32x64xf32>
      tpu.vector_store %arg6[%c0_12, %c0_13], %12 {strides = array<i32>} : memref<32x64xf32, #tpu.memory_space<vmem>>, vector<32x64xf32>,
    } else {
    }
    return
  }
  func.func @transform_0(%arg0: i32, %arg1: i32, %arg2: i32) -> (i32, i32) {
    %c0_i32 = arith.constant 0 : i32
    return %arg0, %arg2 : i32, i32
  }
  func.func @transform_1(%arg0: i32, %arg1: i32, %arg2: i32) -> (i32, i32) {
    %c0_i32 = arith.constant 0 : i32
    return %arg2, %arg1 : i32, i32
  }
  func.func @transform_2(%arg0: i32, %arg1: i32, %arg2: i32) -> (i32, i32) {
    %c0_i32 = arith.constant 0 : i32
    %c0_i32_0 = arith.constant 0 : i32
    return %c0_i32, %arg1 : i32, i32
  }
  func.func @transform_3(%arg0: i32, %arg1: i32, %arg2: i32) -> (i32, i32) {
    %c0_i32 = arith.constant 0 : i32
    return %arg0, %arg1 : i32, i32
  }
}

module attributes {stable_mosaic.version = 11 : i64} {
  func.func @_ffn_add_ln_kernel(%arg0: i32, %arg1: memref<16x32xf32, #tpu.memory_space<vmem>>, %arg2: memref<32x64xf32, #tpu.memory_space<vmem>>, %arg3: memref<1x64xf32, #tpu.memory_space<vmem>>, %arg4: memref<64x32xf32, #tpu.memory_space<vmem>>, %arg5: memref<1x32xf32, #tpu.memory_space<vmem>>, %arg6: memref<1x32xf32, #tpu.memory_space<vmem>>, %arg7: memref<1x32xf32, #tpu.memory_space<vmem>>, %arg8: memref<16x32xf32, #tpu.memory_space<vmem>>) attributes {dimension_semantics = [#tpu.dimension_semantics<parallel>], iteration_bounds = array<i64: 1>, scalar_prefetch = 0 : i64, scratch_operands = 0 : i64, tpu.core_type = #tpu.core_type<tc>, window_params = [{transform_indices = @transform_0, window_bounds = array<i64: 16, 32>}, {pipeline_mode = #tpu.pipeline_mode<synchronous>, transform_indices = @transform_1, window_bounds = array<i64: 32, 64>}, {pipeline_mode = #tpu.pipeline_mode<synchronous>, transform_indices = @transform_2, window_bounds = array<i64: 1, 64>}, {pipeline_mode = #tpu.pipeline_mode<synchronous>, transform_indices = @transform_3, window_bounds = array<i64: 64, 32>}, {pipeline_mode = #tpu.pipeline_mode<synchronous>, transform_indices = @transform_4, window_bounds = array<i64: 1, 32>}, {pipeline_mode = #tpu.pipeline_mode<synchronous>, transform_indices = @transform_5, window_bounds = array<i64: 1, 32>}, {pipeline_mode = #tpu.pipeline_mode<synchronous>, transform_indices = @transform_6, window_bounds = array<i64: 1, 32>}, {transform_indices = @transform_7, window_bounds = array<i64: 16, 32>}]} {
    %c0 = arith.constant 0 : index
    %c0_0 = arith.constant 0 : index
    %0 = vector.load %arg1[%c0, %c0_0] : memref<16x32xf32, #tpu.memory_space<vmem>>, vector<16x32xf32>
    %c0_1 = arith.constant 0 : index
    %c0_2 = arith.constant 0 : index
    %1 = vector.load %arg2[%c0_1, %c0_2] : memref<32x64xf32, #tpu.memory_space<vmem>>, vector<32x64xf32>
    %cst = arith.constant dense<0.000000e+00> : vector<16x64xf32>
    %2 = tpu.matmul %0, %1, %cst {dimension_numbers = #tpu.dot_dimension_numbers<[1], [0], [0], [1], [0, 0, 1, 1], [], []>} : vector<16x32xf32>, vector<32x64xf32>, vector<16x64xf32> -> vector<16x64xf32>
    %c0_3 = arith.constant 0 : index
    %c0_4 = arith.constant 0 : index
    %3 = vector.load %arg3[%c0_3, %c0_4] : memref<1x64xf32, #tpu.memory_space<vmem>>, vector<1x64xf32>
    %4 = vector.broadcast %3 : vector<1x64xf32> to vector<16x64xf32>
    %5 = arith.addf %2, %4 : vector<16x64xf32>
    %cst_5 = arith.constant 0.000000e+00 : f32
    %6 = vector.broadcast %cst_5 : f32 to vector<16x64xf32>
    %7 = arith.maximumf %5, %6 : vector<16x64xf32>
    %c0_6 = arith.constant 0 : index
    %c0_7 = arith.constant 0 : index
    %8 = vector.load %arg4[%c0_6, %c0_7] : memref<64x32xf32, #tpu.memory_space<vmem>>, vector<64x32xf32>
    %cst_8 = arith.constant dense<0.000000e+00> : vector<16x32xf32>
    %9 = tpu.matmul %7, %8, %cst_8 {dimension_numbers = #tpu.dot_dimension_numbers<[1], [0], [0], [1], [0, 0, 1, 1], [], []>} : vector<16x64xf32>, vector<64x32xf32>, vector<16x32xf32> -> vector<16x32xf32>
    %c0_9 = arith.constant 0 : index
    %c0_10 = arith.constant 0 : index
    %10 = vector.load %arg5[%c0_9, %c0_10] : memref<1x32xf32, #tpu.memory_space<vmem>>, vector<1x32xf32>
    %11 = vector.broadcast %10 : vector<1x32xf32> to vector<16x32xf32>
    %12 = arith.addf %9, %11 : vector<16x32xf32>
    %cst_11 = arith.constant 0.000000e+00 : f32
    %13 = vector.broadcast %cst_11 : f32 to vector<16x32xf32>
    %14 = arith.maximumf %12, %13 : vector<16x32xf32>
    %15 = arith.addf %14, %0 : vector<16x32xf32>
    %cst_12 = arith.constant dense<0.000000e+00> : vector<16xf32>
    %16 = vector.multi_reduction <add>, %15, %cst_12 [1] : vector<16x32xf32> to vector<16xf32>
    %17 = vector.shape_cast %16 : vector<16xf32> to vector<16x1xf32>
    %cst_13 = arith.constant 3.200000e+01 : f32
    %18 = vector.broadcast %cst_13 : f32 to vector<16x1xf32>
    %19 = arith.divf %17, %18 : vector<16x1xf32>
    %20 = vector.broadcast %19 : vector<16x1xf32> to vector<16x32xf32>
    %21 = arith.subf %15, %20 : vector<16x32xf32>
    %22 = arith.mulf %21, %21 : vector<16x32xf32>
    %cst_14 = arith.constant dense<0.000000e+00> : vector<16xf32>
    %23 = vector.multi_reduction <add>, %22, %cst_14 [1] : vector<16x32xf32> to vector<16xf32>
    %24 = vector.shape_cast %23 : vector<16xf32> to vector<16x1xf32>
    %cst_15 = arith.constant 3.200000e+01 : f32
    %25 = vector.broadcast %cst_15 : f32 to vector<16x1xf32>
    %26 = arith.divf %24, %25 : vector<16x1xf32>
    %27 = vector.broadcast %19 : vector<16x1xf32> to vector<16x32xf32>
    %28 = arith.subf %15, %27 : vector<16x32xf32>
    %cst_16 = arith.constant 9.99999974E-6 : f32
    %29 = vector.broadcast %cst_16 : f32 to vector<16x1xf32>
    %30 = arith.addf %26, %29 : vector<16x1xf32>
    %31 = math.rsqrt %30 : vector<16x1xf32>
    %32 = vector.broadcast %31 : vector<16x1xf32> to vector<16x32xf32>
    %33 = arith.mulf %28, %32 : vector<16x32xf32>
    %c0_17 = arith.constant 0 : index
    %c0_18 = arith.constant 0 : index
    %34 = vector.load %arg6[%c0_17, %c0_18] : memref<1x32xf32, #tpu.memory_space<vmem>>, vector<1x32xf32>
    %35 = vector.broadcast %34 : vector<1x32xf32> to vector<16x32xf32>
    %36 = arith.mulf %33, %35 : vector<16x32xf32>
    %c0_19 = arith.constant 0 : index
    %c0_20 = arith.constant 0 : index
    %37 = vector.load %arg7[%c0_19, %c0_20] : memref<1x32xf32, #tpu.memory_space<vmem>>, vector<1x32xf32>
    %38 = vector.broadcast %37 : vector<1x32xf32> to vector<16x32xf32>
    %39 = arith.addf %36, %38 : vector<16x32xf32>
    %c0_21 = arith.constant 0 : index
    %c0_22 = arith.constant 0 : index
    %40 = vector.load %arg8[%c0_21, %c0_22] : memref<16x32xf32, #tpu.memory_space<vmem>>, vector<16x32xf32>
    tpu.vector_store %arg8[%c0_21, %c0_22], %39 {strides = array<i32>} : memref<16x32xf32, #tpu.memory_space<vmem>>, vector<16x32xf32>,
    return
  }
  func.func @transform_0(%arg0: i32) -> (i32, i32) {
    %c0_i32 = arith.constant 0 : i32
    %c0_i32_0 = arith.constant 0 : i32
    return %arg0, %c0_i32 : i32, i32
  }
  func.func @transform_1(%arg0: i32) -> (i32, i32) {
    %c0_i32 = arith.constant 0 : i32
    %c0_i32_0 = arith.constant 0 : i32
    %c0_i32_1 = arith.constant 0 : i32
    return %c0_i32, %c0_i32_0 : i32, i32
  }
  func.func @transform_2(%arg0: i32) -> (i32, i32) {
    %c0_i32 = arith.constant 0 : i32
    %c0_i32_0 = arith.constant 0 : i32
    %c0_i32_1 = arith.constant 0 : i32
    return %c0_i32, %c0_i32_0 : i32, i32
  }
  func.func @transform_3(%arg0: i32) -> (i32, i32) {
    %c0_i32 = arith.constant 0 : i32
    %c0_i32_0 = arith.constant 0 : i32
    %c0_i32_1 = arith.constant 0 : i32
    return %c0_i32, %c0_i32_0 : i32, i32
  }
  func.func @transform_4(%arg0: i32) -> (i32, i32) {
    %c0_i32 = arith.constant 0 : i32
    %c0_i32_0 = arith.constant 0 : i32
    %c0_i32_1 = arith.constant 0 : i32
    return %c0_i32, %c0_i32_0 : i32, i32
  }
  func.func @transform_5(%arg0: i32) -> (i32, i32) {
    %c0_i32 = arith.constant 0 : i32
    %c0_i32_0 = arith.constant 0 : i32
    %c0_i32_1 = arith.constant 0 : i32
    return %c0_i32, %c0_i32_0 : i32, i32
  }
  func.func @transform_6(%arg0: i32) -> (i32, i32) {
    %c0_i32 = arith.constant 0 : i32
    %c0_i32_0 = arith.constant 0 : i32
    %c0_i32_1 = arith.constant 0 : i32
    return %c0_i32, %c0_i32_0 : i32, i32
  }
  func.func @transform_7(%arg0: i32) -> (i32, i32) {
    %c0_i32 = arith.constant 0 : i32
    %c0_i32_0 = arith.constant 0 : i32
    return %arg0, %c0_i32 : i32, i32
  }
}

module attributes {stable_mosaic.version = 11 : i64} {
  func.func @_linear_kernel(%arg0: i32, %arg1: i32, %arg2: i32, %arg3: memref<32x32xf32, #tpu.memory_space<vmem>>, %arg4: memref<32x64xf32, #tpu.memory_space<vmem>>, %arg5: memref<1x64xf32, #tpu.memory_space<vmem>>, %arg6: memref<32x64xf32, #tpu.memory_space<vmem>>, %arg7: memref<32x64xf32, #tpu.memory_space<vmem>>) attributes {dimension_semantics = [#tpu.dimension_semantics<parallel>, #tpu.dimension_semantics<parallel>, #tpu.dimension_semantics<arbitrary>], iteration_bounds = array<i64: 1, 1, 1>, scalar_prefetch = 0 : i64, scratch_operands = 1 : i64, tpu.core_type = #tpu.core_type<tc>, window_params = [{transform_indices = @transform_0, window_bounds = array<i64: 32, 32>}, {transform_indices = @transform_1, window_bounds = array<i64: 32, 64>}, {transform_indices = @transform_2, window_bounds = array<i64: 1, 64>}, {transform_indices = @transform_3, window_bounds = array<i64: 32, 64>}]} {
    %c0_i32 = arith.constant 0 : i32
    %0 = arith.cmpi eq, %arg2, %c0_i32 : i32
    %1 = arith.extui %0 : i1 to i32
    %c0_i32_0 = arith.constant 0 : i32
    %2 = arith.cmpi ne, %1, %c0_i32_0 : i32
    scf.if %2 {
      %c0_10 = arith.constant 0 : index
      %c0_11 = arith.constant 0 : index
      %12 = vector.load %arg5[%c0_10, %c0_11] : memref<1x64xf32, #tpu.memory_space<vmem>>, vector<1x64xf32>
      %13 = vector.shape_cast %12 : vector<1x64xf32> to vector<1x64xf32>
      %14 = vector.broadcast %13 : vector<1x64xf32> to vector<32x64xf32>
      %c0_12 = arith.constant 0 : index
      %c0_13 = arith.constant 0 : index
      %15 = vector.load %arg7[%c0_12, %c0_13] : memref<32x64xf32, #tpu.memory_space<vmem>>, vector<32x64xf32>
      tpu.vector_store %arg7[%c0_12, %c0_13], %14 {strides = array<i32>} : memref<32x64xf32, #tpu.memory_space<vmem>>, vector<32x64xf32>,
    } else {
    }
    %c0 = arith.constant 0 : index
    %c0_1 = arith.constant 0 : index
    %3 = vector.load %arg7[%c0, %c0_1] : memref<32x64xf32, #tpu.memory_space<vmem>>, vector<32x64xf32>
    %c0_2 = arith.constant 0 : index
    %c0_3 = arith.constant 0 : index
    %4 = vector.load %arg3[%c0_2, %c0_3] : memref<32x32xf32, #tpu.memory_space<vmem>>, vector<32x32xf32>
    %c0_4 = arith.constant 0 : index
    %c0_5 = arith.constant 0 : index
    %5 = vector.load %arg4[%c0_4, %c0_5] : memref<32x64xf32, #tpu.memory_space<vmem>>, vector<32x64xf32>
    %cst = arith.constant dense<0.000000e+00> : vector<32x64xf32>
    %6 = tpu.matmul %4, %5, %cst {dimension_numbers = #tpu.dot_dimension_numbers<[1], [0], [0], [1], [0, 0, 1, 1], [], []>} : vector<32x32xf32>, vector<32x64xf32>, vector<32x64xf32> -> vector<32x64xf32>
    %7 = arith.addf %3, %6 : vector<32x64xf32>
    %c0_6 = arith.constant 0 : index
    %c0_7 = arith.constant 0 : index
    %8 = vector.load %arg7[%c0_6, %c0_7] : memref<32x64xf32, #tpu.memory_space<vmem>>, vector<32x64xf32>
    tpu.vector_store %arg7[%c0_6, %c0_7], %7 {strides = array<i32>} : memref<32x64xf32, #tpu.memory_space<vmem>>, vector<32x64xf32>,
    %c0_i32_8 = arith.constant 0 : i32
    %9 = arith.cmpi eq, %arg2, %c0_i32_8 : i32
    %10 = arith.extui %9 : i1 to i32
    %c0_i32_9 = arith.constant 0 : i32
    %11 = arith.cmpi ne, %10, %c0_i32_9 : i32
    scf.if %11 {
      %c0_10 = arith.constant 0 : index
      %c0_11 = arith.constant 0 : index
      %12 = vector.load %arg7[%c0_10, %c0_11] : memref<32x64xf32, #tpu.memory_space<vmem>>, vector<32x64xf32>
      %c0_12 = arith.constant 0 : index
      %c0_13 = arith.constant 0 : index
      %13 = vector.load %arg6[%c0_12, %c0_13] : memref<32x64xf32, #tpu.memory_space<vmem>>, vector<32x64xf32>
      tpu.vector_store %arg6[%c0_12, %c0_13], %12 {strides = array<i32>} : memref<32x64xf32, #tpu.memory_space<vmem>>, vector<32x64xf32>,
    } else {
    }
    return
  }
  func.func @transform_0(%arg0: i32, %arg1: i32, %arg2: i32) -> (i32, i32) {
    %c0_i32 = arith.constant 0 : i32
    return %arg0, %arg2 : i32, i32
  }
  func.func @transform_1(%arg0: i32, %arg1: i32, %arg2: i32) -> (i32, i32) {
    %c0_i32 = arith.constant 0 : i32
    return %arg2, %arg1 : i32, i32
  }
  func.func @transform_2(%arg0: i32, %arg1: i32, %arg2: i32) -> (i32, i32) {
    %c0_i32 = arith.constant 0 : i32
    %c0_i32_0 = arith.constant 0 : i32
    return %c0_i32, %arg1 : i32, i32
  }
  func.func @transform_3(%arg0: i32, %arg1: i32, %arg2: i32) -> (i32, i32) {
    %c0_i32 = arith.constant 0 : i32
    return %arg0, %arg1 : i32, i32
  }
}

module attributes {stable_mosaic.version = 11 : i64} {
  func.func @_mha_kernel(%arg0: i32, %arg1: memref<1x8x32xf32, #tpu.memory_space<vmem>>, %arg2: memref<1x16x64xf32, #tpu.memory_space<vmem>>, %arg3: memref<1x8x32xf32, #tpu.memory_space<vmem>>) attributes {dimension_semantics = [#tpu.dimension_semantics<parallel>], iteration_bounds = array<i64: 2>, scalar_prefetch = 0 : i64, scratch_operands = 0 : i64, tpu.core_type = #tpu.core_type<tc>, window_params = [{transform_indices = @transform_0, window_bounds = array<i64: 1, 8, 32>}, {transform_indices = @transform_1, window_bounds = array<i64: 1, 16, 64>}, {transform_indices = @transform_2, window_bounds = array<i64: 1, 8, 32>}]} {
    %c0 = arith.constant 0 : index
    %c0_0 = arith.constant 0 : index
    %c0_1 = arith.constant 0 : index
    %0 = vector.load %arg1[%c0, %c0_0, %c0_1] : memref<1x8x32xf32, #tpu.memory_space<vmem>>, vector<1x8x32xf32>
    %1 = vector.shape_cast %0 : vector<1x8x32xf32> to vector<8x32xf32>
    %c0_2 = arith.constant 0 : index
    %c0_3 = arith.constant 0 : index
    %c0_4 = arith.constant 0 : index
    %2 = vector.load %arg2[%c0_2, %c0_3, %c0_4] : memref<1x16x64xf32, #tpu.memory_space<vmem>>, vector<1x16x64xf32>
    %3 = vector.shape_cast %2 : vector<1x16x64xf32> to vector<16x64xf32>
    %4 = vector.extract_strided_slice %3 {offsets = [0, 0], sizes = [16, 32], strides = [1, 1]} : vector<16x64xf32> to vector<16x32xf32>
    %5 = vector.extract_strided_slice %3 {offsets = [0, 32], sizes = [16, 32], strides = [1, 1]} : vector<16x64xf32> to vector<16x32xf32>
    %cst = arith.constant 0.176776692 : f32
    %6 = vector.broadcast %cst : f32 to vector<8x32xf32>
    %7 = arith.mulf %1, %6 : vector<8x32xf32>
    %8 = vector.extract_strided_slice %7 {offsets = [0, 0], sizes = [8, 8], strides = [1, 1]} : vector<8x32xf32> to vector<8x8xf32>
    %9 = vector.extract_strided_slice %4 {offsets = [0, 0], sizes = [16, 8], strides = [1, 1]} : vector<16x32xf32> to vector<16x8xf32>
    %10 = vector.extract_strided_slice %5 {offsets = [0, 0], sizes = [16, 8], strides = [1, 1]} : vector<16x32xf32> to vector<16x8xf32>
    %11 = tpu.transpose %9, [1, 0] : vector<16x8xf32> -> vector<8x16xf32>
    %cst_5 = arith.constant dense<0.000000e+00> : vector<8x16xf32>
    %12 = tpu.matmul %8, %11, %cst_5 {dimension_numbers = #tpu.dot_dimension_numbers<[1], [0], [0], [1], [0, 0, 1, 1], [], []>} : vector<8x8xf32>, vector<8x16xf32>, vector<8x16xf32> -> vector<8x16xf32>
    %cst_6 = arith.constant dense<0xFF800000> : vector<8xf32>
    %13 = vector.multi_reduction <maximumf>, %12, %cst_6 [1] : vector<8x16xf32> to vector<8xf32>
    %14 = vector.shape_cast %13 : vector<8xf32> to vector<8x1xf32>
    %15 = vector.broadcast %14 : vector<8x1xf32> to vector<8x16xf32>
    %16 = arith.subf %12, %15 : vector<8x16xf32>
    %17 = math.exp %16 : vector<8x16xf32>
    %cst_7 = arith.constant dense<0.000000e+00> : vector<8xf32>
    %18 = vector.multi_reduction <add>, %17, %cst_7 [1] : vector<8x16xf32> to vector<8xf32>
    %19 = vector.shape_cast %18 : vector<8xf32> to vector<8x1xf32>
    %cst_8 = arith.constant dense<0.000000e+00> : vector<8x8xf32>
    %20 = tpu.matmul %17, %10, %cst_8 {dimension_numbers = #tpu.dot_dimension_numbers<[1], [0], [0], [1], [0, 0, 1, 1], [], []>} : vector<8x16xf32>, vector<16x8xf32>, vector<8x8xf32> -> vector<8x8xf32>
    %21 = tpu.reciprocal %19 {approx = true} : vector<8x1xf32> -> vector<8x1xf32>
    %22 = vector.broadcast %21 : vector<8x1xf32> to vector<8x8xf32>
    %23 = arith.mulf %20, %22 : vector<8x8xf32>
    %24 = vector.extract_strided_slice %7 {offsets = [0, 8], sizes = [8, 8], strides = [1, 1]} : vector<8x32xf32> to vector<8x8xf32>
    %25 = vector.extract_strided_slice %4 {offsets = [0, 8], sizes = [16, 8], strides = [1, 1]} : vector<16x32xf32> to vector<16x8xf32>
    %26 = vector.extract_strided_slice %5 {offsets = [0, 8], sizes = [16, 8], strides = [1, 1]} : vector<16x32xf32> to vector<16x8xf32>
    %27 = tpu.transpose %25, [1, 0] : vector<16x8xf32> -> vector<8x16xf32>
    %cst_9 = arith.constant dense<0.000000e+00> : vector<8x16xf32>
    %28 = tpu.matmul %24, %27, %cst_9 {dimension_numbers = #tpu.dot_dimension_numbers<[1], [0], [0], [1], [0, 0, 1, 1], [], []>} : vector<8x8xf32>, vector<8x16xf32>, vector<8x16xf32> -> vector<8x16xf32>
    %cst_10 = arith.constant dense<0xFF800000> : vector<8xf32>
    %29 = vector.multi_reduction <maximumf>, %28, %cst_10 [1] : vector<8x16xf32> to vector<8xf32>
    %30 = vector.shape_cast %29 : vector<8xf32> to vector<8x1xf32>
    %31 = vector.broadcast %30 : vector<8x1xf32> to vector<8x16xf32>
    %32 = arith.subf %28, %31 : vector<8x16xf32>
    %33 = math.exp %32 : vector<8x16xf32>
    %cst_11 = arith.constant dense<0.000000e+00> : vector<8xf32>
    %34 = vector.multi_reduction <add>, %33, %cst_11 [1] : vector<8x16xf32> to vector<8xf32>
    %35 = vector.shape_cast %34 : vector<8xf32> to vector<8x1xf32>
    %cst_12 = arith.constant dense<0.000000e+00> : vector<8x8xf32>
    %36 = tpu.matmul %33, %26, %cst_12 {dimension_numbers = #tpu.dot_dimension_numbers<[1], [0], [0], [1], [0, 0, 1, 1], [], []>} : vector<8x16xf32>, vector<16x8xf32>, vector<8x8xf32> -> vector<8x8xf32>
    %37 = tpu.reciprocal %35 {approx = true} : vector<8x1xf32> -> vector<8x1xf32>
    %38 = vector.broadcast %37 : vector<8x1xf32> to vector<8x8xf32>
    %39 = arith.mulf %36, %38 : vector<8x8xf32>
    %40 = vector.extract_strided_slice %7 {offsets = [0, 16], sizes = [8, 8], strides = [1, 1]} : vector<8x32xf32> to vector<8x8xf32>
    %41 = vector.extract_strided_slice %4 {offsets = [0, 16], sizes = [16, 8], strides = [1, 1]} : vector<16x32xf32> to vector<16x8xf32>
    %42 = vector.extract_strided_slice %5 {offsets = [0, 16], sizes = [16, 8], strides = [1, 1]} : vector<16x32xf32> to vector<16x8xf32>
    %43 = tpu.transpose %41, [1, 0] : vector<16x8xf32> -> vector<8x16xf32>
    %cst_13 = arith.constant dense<0.000000e+00> : vector<8x16xf32>
    %44 = tpu.matmul %40, %43, %cst_13 {dimension_numbers = #tpu.dot_dimension_numbers<[1], [0], [0], [1], [0, 0, 1, 1], [], []>} : vector<8x8xf32>, vector<8x16xf32>, vector<8x16xf32> -> vector<8x16xf32>
    %cst_14 = arith.constant dense<0xFF800000> : vector<8xf32>
    %45 = vector.multi_reduction <maximumf>, %44, %cst_14 [1] : vector<8x16xf32> to vector<8xf32>
    %46 = vector.shape_cast %45 : vector<8xf32> to vector<8x1xf32>
    %47 = vector.broadcast %46 : vector<8x1xf32> to vector<8x16xf32>
    %48 = arith.subf %44, %47 : vector<8x16xf32>
    %49 = math.exp %48 : vector<8x16xf32>
    %cst_15 = arith.constant dense<0.000000e+00> : vector<8xf32>
    %50 = vector.multi_reduction <add>, %49, %cst_15 [1] : vector<8x16xf32> to vector<8xf32>
    %51 = vector.shape_cast %50 : vector<8xf32> to vector<8x1xf32>
    %cst_16 = arith.constant dense<0.000000e+00> : vector<8x8xf32>
    %52 = tpu.matmul %49, %42, %cst_16 {dimension_numbers = #tpu.dot_dimension_numbers<[1], [0], [0], [1], [0, 0, 1, 1], [], []>} : vector<8x16xf32>, vector<16x8xf32>, vector<8x8xf32> -> vector<8x8xf32>
    %53 = tpu.reciprocal %51 {approx = true} : vector<8x1xf32> -> vector<8x1xf32>
    %54 = vector.broadcast %53 : vector<8x1xf32> to vector<8x8xf32>
    %55 = arith.mulf %52, %54 : vector<8x8xf32>
    %56 = vector.extract_strided_slice %7 {offsets = [0, 24], sizes = [8, 8], strides = [1, 1]} : vector<8x32xf32> to vector<8x8xf32>
    %57 = vector.extract_strided_slice %4 {offsets = [0, 24], sizes = [16, 8], strides = [1, 1]} : vector<16x32xf32> to vector<16x8xf32>
    %58 = vector.extract_strided_slice %5 {offsets = [0, 24], sizes = [16, 8], strides = [1, 1]} : vector<16x32xf32> to vector<16x8xf32>
    %59 = tpu.transpose %57, [1, 0] : vector<16x8xf32> -> vector<8x16xf32>
    %cst_17 = arith.constant dense<0.000000e+00> : vector<8x16xf32>
    %60 = tpu.matmul %56, %59, %cst_17 {dimension_numbers = #tpu.dot_dimension_numbers<[1], [0], [0], [1], [0, 0, 1, 1], [], []>} : vector<8x8xf32>, vector<8x16xf32>, vector<8x16xf32> -> vector<8x16xf32>
    %cst_18 = arith.constant dense<0xFF800000> : vector<8xf32>
    %61 = vector.multi_reduction <maximumf>, %60, %cst_18 [1] : vector<8x16xf32> to vector<8xf32>
    %62 = vector.shape_cast %61 : vector<8xf32> to vector<8x1xf32>
    %63 = vector.broadcast %62 : vector<8x1xf32> to vector<8x16xf32>
    %64 = arith.subf %60, %63 : vector<8x16xf32>
    %65 = math.exp %64 : vector<8x16xf32>
    %cst_19 = arith.constant dense<0.000000e+00> : vector<8xf32>
    %66 = vector.multi_reduction <add>, %65, %cst_19 [1] : vector<8x16xf32> to vector<8xf32>
    %67 = vector.shape_cast %66 : vector<8xf32> to vector<8x1xf32>
    %cst_20 = arith.constant dense<0.000000e+00> : vector<8x8xf32>
    %68 = tpu.matmul %65, %58, %cst_20 {dimension_numbers = #tpu.dot_dimension_numbers<[1], [0], [0], [1], [0, 0, 1, 1], [], []>} : vector<8x16xf32>, vector<16x8xf32>, vector<8x8xf32> -> vector<8x8xf32>
    %69 = tpu.reciprocal %67 {approx = true} : vector<8x1xf32> -> vector<8x1xf32>
    %70 = vector.broadcast %69 : vector<8x1xf32> to vector<8x8xf32>
    %71 = arith.mulf %68, %70 : vector<8x8xf32>
    %72 = tpu.concatenate %23, %39, %55, %71 in 1 : vector<8x8xf32>, vector<8x8xf32>, vector<8x8xf32>, vector<8x8xf32> -> vector<8x32xf32>
    %c0_21 = arith.constant 0 : index
    %c0_22 = arith.constant 0 : index
    %c0_23 = arith.constant 0 : index
    %73 = vector.load %arg3[%c0_21, %c0_22, %c0_23] : memref<1x8x32xf32, #tpu.memory_space<vmem>>, vector<1x8x32xf32>
    %74 = vector.shape_cast %73 : vector<1x8x32xf32> to vector<8x32xf32>
    %75 = vector.shape_cast %72 : vector<8x32xf32> to vector<1x8x32xf32>
    tpu.vector_store %arg3[%c0_21, %c0_22, %c0_23], %75 {strides = array<i32>} : memref<1x8x32xf32, #tpu.memory_space<vmem>>, vector<1x8x32xf32>,
    return
  }
  func.func @transform_0(%arg0: i32) -> (i32, i32, i32) {
    %c0_i32 = arith.constant 0 : i32
    %c0_i32_0 = arith.constant 0 : i32
    %c0_i32_1 = arith.constant 0 : i32
    return %arg0, %c0_i32, %c0_i32_0 : i32, i32, i32
  }
  func.func @transform_1(%arg0: i32) -> (i32, i32, i32) {
    %c0_i32 = arith.constant 0 : i32
    %c0_i32_0 = arith.constant 0 : i32
    %c0_i32_1 = arith.constant 0 : i32
    return %arg0, %c0_i32, %c0_i32_0 : i32, i32, i32
  }
  func.func @transform_2(%arg0: i32) -> (i32, i32, i32) {
    %c0_i32 = arith.constant 0 : i32
    %c0_i32_0 = arith.constant 0 : i32
    %c0_i32_1 = arith.constant 0 : i32
    return %arg0, %c0_i32, %c0_i32_0 : i32, i32, i32
  }
}

module attributes {stable_mosaic.version = 11 : i64} {
  func.func @_proj_add_ln_kernel(%arg0: i32, %arg1: memref<16x32xf32, #tpu.memory_space<vmem>>, %arg2: memref<32x32xf32, #tpu.memory_space<vmem>>, %arg3: memref<1x32xf32, #tpu.memory_space<vmem>>, %arg4: memref<16x32xf32, #tpu.memory_space<vmem>>, %arg5: memref<1x32xf32, #tpu.memory_space<vmem>>, %arg6: memref<1x32xf32, #tpu.memory_space<vmem>>, %arg7: memref<16x32xf32, #tpu.memory_space<vmem>>) attributes {dimension_semantics = [#tpu.dimension_semantics<parallel>], iteration_bounds = array<i64: 1>, scalar_prefetch = 0 : i64, scratch_operands = 0 : i64, tpu.core_type = #tpu.core_type<tc>, window_params = [{transform_indices = @transform_0, window_bounds = array<i64: 16, 32>}, {pipeline_mode = #tpu.pipeline_mode<synchronous>, transform_indices = @transform_1, window_bounds = array<i64: 32, 32>}, {pipeline_mode = #tpu.pipeline_mode<synchronous>, transform_indices = @transform_2, window_bounds = array<i64: 1, 32>}, {transform_indices = @transform_3, window_bounds = array<i64: 16, 32>}, {pipeline_mode = #tpu.pipeline_mode<synchronous>, transform_indices = @transform_4, window_bounds = array<i64: 1, 32>}, {pipeline_mode = #tpu.pipeline_mode<synchronous>, transform_indices = @transform_5, window_bounds = array<i64: 1, 32>}, {transform_indices = @transform_6, window_bounds = array<i64: 16, 32>}]} {
    %c0 = arith.constant 0 : index
    %c0_0 = arith.constant 0 : index
    %0 = vector.load %arg1[%c0, %c0_0] : memref<16x32xf32, #tpu.memory_space<vmem>>, vector<16x32xf32>
    %c0_1 = arith.constant 0 : index
    %c0_2 = arith.constant 0 : index
    %1 = vector.load %arg2[%c0_1, %c0_2] : memref<32x32xf32, #tpu.memory_space<vmem>>, vector<32x32xf32>
    %cst = arith.constant dense<0.000000e+00> : vector<16x32xf32>
    %2 = tpu.matmul %0, %1, %cst {dimension_numbers = #tpu.dot_dimension_numbers<[1], [0], [0], [1], [0, 0, 1, 1], [], []>} : vector<16x32xf32>, vector<32x32xf32>, vector<16x32xf32> -> vector<16x32xf32>
    %c0_3 = arith.constant 0 : index
    %c0_4 = arith.constant 0 : index
    %3 = vector.load %arg3[%c0_3, %c0_4] : memref<1x32xf32, #tpu.memory_space<vmem>>, vector<1x32xf32>
    %4 = vector.broadcast %3 : vector<1x32xf32> to vector<16x32xf32>
    %5 = arith.addf %2, %4 : vector<16x32xf32>
    %c0_5 = arith.constant 0 : index
    %c0_6 = arith.constant 0 : index
    %6 = vector.load %arg4[%c0_5, %c0_6] : memref<16x32xf32, #tpu.memory_space<vmem>>, vector<16x32xf32>
    %7 = arith.addf %5, %6 : vector<16x32xf32>
    %cst_7 = arith.constant dense<0.000000e+00> : vector<16xf32>
    %8 = vector.multi_reduction <add>, %7, %cst_7 [1] : vector<16x32xf32> to vector<16xf32>
    %9 = vector.shape_cast %8 : vector<16xf32> to vector<16x1xf32>
    %cst_8 = arith.constant 3.200000e+01 : f32
    %10 = vector.broadcast %cst_8 : f32 to vector<16x1xf32>
    %11 = arith.divf %9, %10 : vector<16x1xf32>
    %12 = vector.broadcast %11 : vector<16x1xf32> to vector<16x32xf32>
    %13 = arith.subf %7, %12 : vector<16x32xf32>
    %14 = arith.mulf %13, %13 : vector<16x32xf32>
    %cst_9 = arith.constant dense<0.000000e+00> : vector<16xf32>
    %15 = vector.multi_reduction <add>, %14, %cst_9 [1] : vector<16x32xf32> to vector<16xf32>
    %16 = vector.shape_cast %15 : vector<16xf32> to vector<16x1xf32>
    %cst_10 = arith.constant 3.200000e+01 : f32
    %17 = vector.broadcast %cst_10 : f32 to vector<16x1xf32>
    %18 = arith.divf %16, %17 : vector<16x1xf32>
    %19 = vector.broadcast %11 : vector<16x1xf32> to vector<16x32xf32>
    %20 = arith.subf %7, %19 : vector<16x32xf32>
    %cst_11 = arith.constant 9.99999974E-6 : f32
    %21 = vector.broadcast %cst_11 : f32 to vector<16x1xf32>
    %22 = arith.addf %18, %21 : vector<16x1xf32>
    %23 = math.rsqrt %22 : vector<16x1xf32>
    %24 = vector.broadcast %23 : vector<16x1xf32> to vector<16x32xf32>
    %25 = arith.mulf %20, %24 : vector<16x32xf32>
    %c0_12 = arith.constant 0 : index
    %c0_13 = arith.constant 0 : index
    %26 = vector.load %arg5[%c0_12, %c0_13] : memref<1x32xf32, #tpu.memory_space<vmem>>, vector<1x32xf32>
    %27 = vector.broadcast %26 : vector<1x32xf32> to vector<16x32xf32>
    %28 = arith.mulf %25, %27 : vector<16x32xf32>
    %c0_14 = arith.constant 0 : index
    %c0_15 = arith.constant 0 : index
    %29 = vector.load %arg6[%c0_14, %c0_15] : memref<1x32xf32, #tpu.memory_space<vmem>>, vector<1x32xf32>
    %30 = vector.broadcast %29 : vector<1x32xf32> to vector<16x32xf32>
    %31 = arith.addf %28, %30 : vector<16x32xf32>
    %c0_16 = arith.constant 0 : index
    %c0_17 = arith.constant 0 : index
    %32 = vector.load %arg7[%c0_16, %c0_17] : memref<16x32xf32, #tpu.memory_space<vmem>>, vector<16x32xf32>
    tpu.vector_store %arg7[%c0_16, %c0_17], %31 {strides = array<i32>} : memref<16x32xf32, #tpu.memory_space<vmem>>, vector<16x32xf32>,
    return
  }
  func.func @transform_0(%arg0: i32) -> (i32, i32) {
    %c0_i32 = arith.constant 0 : i32
    %c0_i32_0 = arith.constant 0 : i32
    return %arg0, %c0_i32 : i32, i32
  }
  func.func @transform_1(%arg0: i32) -> (i32, i32) {
    %c0_i32 = arith.constant 0 : i32
    %c0_i32_0 = arith.constant 0 : i32
    %c0_i32_1 = arith.constant 0 : i32
    return %c0_i32, %c0_i32_0 : i32, i32
  }
  func.func @transform_2(%arg0: i32) -> (i32, i32) {
    %c0_i32 = arith.constant 0 : i32
    %c0_i32_0 = arith.constant 0 : i32
    %c0_i32_1 = arith.constant 0 : i32
    return %c0_i32, %c0_i32_0 : i32, i32
  }
  func.func @transform_3(%arg0: i32) -> (i32, i32) {
    %c0_i32 = arith.constant 0 : i32
    %c0_i32_0 = arith.constant 0 : i32
    return %arg0, %c0_i32 : i32, i32
  }
  func.func @transform_4(%arg0: i32) -> (i32, i32) {
    %c0_i32 = arith.constant 0 : i32
    %c0_i32_0 = arith.constant 0 : i32
    %c0_i32_1 = arith.constant 0 : i32
    return %c0_i32, %c0_i32_0 : i32, i32
  }
  func.func @transform_5(%arg0: i32) -> (i32, i32) {
    %c0_i32 = arith.constant 0 : i32
    %c0_i32_0 = arith.constant 0 : i32
    %c0_i32_1 = arith.constant 0 : i32
    return %c0_i32, %c0_i32_0 : i32, i32
  }
  func.func @transform_6(%arg0: i32) -> (i32, i32) {
    %c0_i32 = arith.constant 0 : i32
    %c0_i32_0 = arith.constant 0 : i32
    return %arg0, %c0_i32 : i32, i32
  }
}

module attributes {stable_mosaic.version = 11 : i64} {
  func.func @_linear_kernel(%arg0: i32, %arg1: i32, %arg2: i32, %arg3: memref<16x32xf32, #tpu.memory_space<vmem>>, %arg4: memref<32x128xf32, #tpu.memory_space<vmem>>, %arg5: memref<1x128xf32, #tpu.memory_space<vmem>>, %arg6: memref<16x128xf32, #tpu.memory_space<vmem>>, %arg7: memref<16x128xf32, #tpu.memory_space<vmem>>) attributes {dimension_semantics = [#tpu.dimension_semantics<parallel>, #tpu.dimension_semantics<parallel>, #tpu.dimension_semantics<arbitrary>], iteration_bounds = array<i64: 1, 1, 1>, scalar_prefetch = 0 : i64, scratch_operands = 1 : i64, tpu.core_type = #tpu.core_type<tc>, window_params = [{transform_indices = @transform_0, window_bounds = array<i64: 16, 32>}, {transform_indices = @transform_1, window_bounds = array<i64: 32, 128>}, {transform_indices = @transform_2, window_bounds = array<i64: 1, 128>}, {transform_indices = @transform_3, window_bounds = array<i64: 16, 128>}]} {
    %c0_i32 = arith.constant 0 : i32
    %0 = arith.cmpi eq, %arg2, %c0_i32 : i32
    %1 = arith.extui %0 : i1 to i32
    %c0_i32_0 = arith.constant 0 : i32
    %2 = arith.cmpi ne, %1, %c0_i32_0 : i32
    scf.if %2 {
      %c0_10 = arith.constant 0 : index
      %c0_11 = arith.constant 0 : index
      %12 = vector.load %arg5[%c0_10, %c0_11] : memref<1x128xf32, #tpu.memory_space<vmem>>, vector<1x128xf32>
      %13 = vector.shape_cast %12 : vector<1x128xf32> to vector<1x128xf32>
      %14 = vector.broadcast %13 : vector<1x128xf32> to vector<16x128xf32>
      %c0_12 = arith.constant 0 : index
      %c0_13 = arith.constant 0 : index
      %15 = vector.load %arg7[%c0_12, %c0_13] : memref<16x128xf32, #tpu.memory_space<vmem>>, vector<16x128xf32>
      tpu.vector_store %arg7[%c0_12, %c0_13], %14 {strides = array<i32>} : memref<16x128xf32, #tpu.memory_space<vmem>>, vector<16x128xf32>,
    } else {
    }
    %c0 = arith.constant 0 : index
    %c0_1 = arith.constant 0 : index
    %3 = vector.load %arg7[%c0, %c0_1] : memref<16x128xf32, #tpu.memory_space<vmem>>, vector<16x128xf32>
    %c0_2 = arith.constant 0 : index
    %c0_3 = arith.constant 0 : index
    %4 = vector.load %arg3[%c0_2, %c0_3] : memref<16x32xf32, #tpu.memory_space<vmem>>, vector<16x32xf32>
    %c0_4 = arith.constant 0 : index
    %c0_5 = arith.constant 0 : index
    %5 = vector.load %arg4[%c0_4, %c0_5] : memref<32x128xf32, #tpu.memory_space<vmem>>, vector<32x128xf32>
    %cst = arith.constant dense<0.000000e+00> : vector<16x128xf32>
    %6 = tpu.matmul %4, %5, %cst {dimension_numbers = #tpu.dot_dimension_numbers<[1], [0], [0], [1], [0, 0, 1, 1], [], []>} : vector<16x32xf32>, vector<32x128xf32>, vector<16x128xf32> -> vector<16x128xf32>
    %7 = arith.addf %3, %6 : vector<16x128xf32>
    %c0_6 = arith.constant 0 : index
    %c0_7 = arith.constant 0 : index
    %8 = vector.load %arg7[%c0_6, %c0_7] : memref<16x128xf32, #tpu.memory_space<vmem>>, vector<16x128xf32>
    tpu.vector_store %arg7[%c0_6, %c0_7], %7 {strides = array<i32>} : memref<16x128xf32, #tpu.memory_space<vmem>>, vector<16x128xf32>,
    %c0_i32_8 = arith.constant 0 : i32
    %9 = arith.cmpi eq, %arg2, %c0_i32_8 : i32
    %10 = arith.extui %9 : i1 to i32
    %c0_i32_9 = arith.constant 0 : i32
    %11 = arith.cmpi ne, %10, %c0_i32_9 : i32
    scf.if %11 {
      %c0_10 = arith.constant 0 : index
      %c0_11 = arith.constant 0 : index
      %12 = vector.load %arg7[%c0_10, %c0_11] : memref<16x128xf32, #tpu.memory_space<vmem>>, vector<16x128xf32>
      %c0_12 = arith.constant 0 : index
      %c0_13 = arith.constant 0 : index
      %13 = vector.load %arg6[%c0_12, %c0_13] : memref<16x128xf32, #tpu.memory_space<vmem>>, vector<16x128xf32>
      tpu.vector_store %arg6[%c0_12, %c0_13], %12 {strides = array<i32>} : memref<16x128xf32, #tpu.memory_space<vmem>>, vector<16x128xf32>,
    } else {
    }
    return
  }
  func.func @transform_0(%arg0: i32, %arg1: i32, %arg2: i32) -> (i32, i32) {
    %c0_i32 = arith.constant 0 : i32
    return %arg0, %arg2 : i32, i32
  }
  func.func @transform_1(%arg0: i32, %arg1: i32, %arg2: i32) -> (i32, i32) {
    %c0_i32 = arith.constant 0 : i32
    return %arg2, %arg1 : i32, i32
  }
  func.func @transform_2(%arg0: i32, %arg1: i32, %arg2: i32) -> (i32, i32) {
    %c0_i32 = arith.constant 0 : i32
    %c0_i32_0 = arith.constant 0 : i32
    return %c0_i32, %arg1 : i32, i32
  }
  func.func @transform_3(%arg0: i32, %arg1: i32, %arg2: i32) -> (i32, i32) {
    %c0_i32 = arith.constant 0 : i32
    return %arg0, %arg1 : i32, i32
  }
}

</mosaic_0001>

<bundles_post_ra>
// kernel: transformer_decoder_forward.17
= control target key start
LH: loop header
LB: loop body
LE: loop exit
PB: predicated region body
PF: predicated region fallthrough
CT: control target
= control target key end

     0   :  { %vm22_vm0 = vcmask 785408   ;;  %vm33_vm1 = vcmask 261120   ;;  %s139_s1 = inlined_call_operand.vmem [shape: f32[32,96], index: 1, kind: input, shape index: {}]   ;;  %s140_s2 = inlined_call_operand.vmem [shape: f32[1,96], index: 2, kind: input, shape index: {}]   ;;  %s141_s0 = inlined_call_operand.vmem [shape: f32[16,32], index: 0, kind: input, shape index: {}]   ;;  %s142_s3 = inlined_call_operand.vmem [shape: f32[16,96], index: 3, kind: output, shape index: {}]  }
   0x1   :  { %v32_v0 = vld [vmem:[%s139_s1 + $0x18] sm:$0xff]  ;;  %v31_v1 = vld [vmem:[%s139_s1 + $0x10] sm:$0xff]  ;;  %v30_v2 = vld [vmem:[%s139_s1 + $0x8] sm:$0xff] }
   0x2   :  { %52 = vmatpush.msra.mxu0 %v32_v0  ;;  %81 = vmatpush.msra.mxu1 %v32_v0  ;;  %v85_v3 = vld [vmem:[%s140_s2] ss:$0 sm:$0xff]  ;;  %v28_v6 = vld [vmem:[%s141_s0 + $0x8] sm:$0xff] }
   0x3   :  { %v29_v4 = vld [vmem:[%s139_s1] sm:$0xff]  ;;  %23 = vst.msk [vmem:[#allocation2] sm:$0xff] %vm22_vm0, %v85_v3 }
   0x4   :  { %53 = vmatpush.msra.mxu0 %v31_v1  ;;  %82 = vmatpush.msra.mxu1 %v31_v1  ;;  %v27_v5 = vld [vmem:[%s141_s0] sm:$0xff]  ;;  %24 = vst.msk [vmem:[#allocation2 + $0x8] sm:$0xff] %vm22_vm0, %v85_v3 }
   0x6   :  { %54 = vmatpush.msra.mxu0 %v30_v2  ;;  %83 = vmatpush.msra.mxu1 %v30_v2 }
   0x8   :  { %55 = vmatpush.msra.mxu0 %v29_v4  ;;  %84 = vmatpush.msra.mxu1 %v29_v4 }
   0x9   :  { %79 = vmatmul.msk.f32.vlgmr.msra.gmra.mxu0 %vm33_vm1, %v27_v5  ;;  %80 = vmatmul.msk.f32.vlgmr.msra.gmra.mxu1 %vm33_vm1, %v28_v6 }
   0xa   :  { %v25_v7 = vld [vmem:[#allocation2] sm:$0xff] }
   0xb   :  { %v26_v8 = vld [vmem:[#allocation2 + $0x8] sm:$0xff] }
  0x86   :  { %v57_v9 = vpop.f32.mrf.mxu0  ;;  %v60_v10 = vpop.f32.mrf.mxu1 }
  0x87   :  { %v63_v11 = vadd.f32 %v57_v9, %v25_v7  ;;  %v64_v12 = vadd.f32 %v60_v10, %v26_v8 }
  0x89   :  { %66 = vst.msk [vmem:[#allocation2] sm:$0xff] %vm22_vm0, %v63_v11 }
  0x8a   :  { %67 = vst.msk [vmem:[#allocation2 + $0x8] sm:$0xff] %vm22_vm0, %v64_v12 }
  0x90   :  { %v71_v13 = vld [vmem:[#allocation2] sm:$0xff] }
  0x91   :  { %73 = vst.msk [vmem:[%s142_s3] sm:$0xff] %vm22_vm0, %v71_v13  ;;  %v72_v14 = vld [vmem:[#allocation2 + $0x8] sm:$0xff] }
  0x92   :  { %74 = vst.msk [vmem:[%s142_s3 + $0x8] sm:$0xff] %vm22_vm0, %v72_v14 }

// kernel: transformer_decoder_forward.20
= control target key start
LH: loop header
LB: loop body
LE: loop exit
PB: predicated region body
PF: predicated region fallthrough
CT: control target
= control target key end

     0   :  { %vm22_vm0 = vcmask 261120   ;;  %s140_s1 = inlined_call_operand.vmem [shape: f32[32,32], index: 1, kind: input, shape index: {}]   ;;  %s141_s2 = inlined_call_operand.vmem [shape: f32[1,32], index: 2, kind: input, shape index: {}]   ;;  %s142_s0 = inlined_call_operand.vmem [shape: f32[16,32], index: 0, kind: input, shape index: {}]   ;;  %s143_s3 = inlined_call_operand.vmem [shape: f32[16,32], index: 3, kind: output, shape index: {}]  }
   0x1   :  { %v32_v0 = vld [vmem:[%s140_s1 + $0x18] sm:$0xff]  ;;  %v31_v1 = vld [vmem:[%s140_s1 + $0x10] sm:$0xff]  ;;  %v30_v2 = vld [vmem:[%s140_s1 + $0x8] sm:$0xff] }
   0x2   :  { %52 = vmatpush.msra.mxu0 %v32_v0  ;;  %80 = vmatpush.msra.mxu1 %v32_v0  ;;  %v84_v3 = vld [vmem:[%s141_s2] ss:$0 sm:$0xff]  ;;  %v28_v6 = vld [vmem:[%s142_s0 + $0x8] sm:$0xff] }
   0x3   :  { %v29_v4 = vld [vmem:[%s140_s1] sm:$0xff]  ;;  %23 = vst.msk [vmem:[#allocation2] sm:$0xff] %vm22_vm0, %v84_v3 }
   0x4   :  { %53 = vmatpush.msra.mxu0 %v31_v1  ;;  %81 = vmatpush.msra.mxu1 %v31_v1  ;;  %v27_v5 = vld [vmem:[%s142_s0] sm:$0xff]  ;;  %24 = vst.msk [vmem:[#allocation2 + $0x8] sm:$0xff] %vm22_vm0, %v84_v3 }
   0x6   :  { %54 = vmatpush.msra.mxu0 %v30_v2  ;;  %82 = vmatpush.msra.mxu1 %v30_v2 }
   0x8   :  { %55 = vmatpush.msra.mxu0 %v29_v4  ;;  %83 = vmatpush.msra.mxu1 %v29_v4 }
   0x9   :  { %78 = vmatmul.msk.f32.vlgmr.msra.gmra.mxu0 %vm22_vm0, %v27_v5  ;;  %79 = vmatmul.msk.f32.vlgmr.msra.gmra.mxu1 %vm22_vm0, %v28_v6 }
   0xa   :  { %v25_v7 = vld [vmem:[#allocation2] sm:$0xff] }
   0xb   :  { %v26_v8 = vld [vmem:[#allocation2 + $0x8] sm:$0xff] }
  0x86   :  { %v57_v9 = vpop.f32.mrf.mxu0  ;;  %v60_v10 = vpop.f32.mrf.mxu1 }
  0x87   :  { %v63_v11 = vadd.f32 %v57_v9, %v25_v7  ;;  %v64_v12 = vadd.f32 %v60_v10, %v26_v8 }
  0x89   :  { %65 = vst.msk [vmem:[#allocation2] sm:$0xff] %vm22_vm0, %v63_v11 }
  0x8a   :  { %66 = vst.msk [vmem:[#allocation2 + $0x8] sm:$0xff] %vm22_vm0, %v64_v12 }
  0x90   :  { %v70_v13 = vld [vmem:[#allocation2] sm:$0xff] }
  0x91   :  { %72 = vst.msk [vmem:[%s143_s3] sm:$0xff] %vm22_vm0, %v70_v13  ;;  %v71_v14 = vld [vmem:[#allocation2 + $0x8] sm:$0xff] }
  0x92   :  { %73 = vst.msk [vmem:[%s143_s3 + $0x8] sm:$0xff] %vm22_vm0, %v71_v14 }

// kernel: transformer_decoder_forward.19
= control target key start
LH: loop header
LB: loop body
LE: loop exit
PB: predicated region body
PF: predicated region fallthrough
CT: control target
= control target key end

     0   :  { %vm33_vm0 = vcmask 261120   ;;  %v152_v17 = vmov 32.0   ;;  %s235_s1 = inlined_call_operand.vmem [shape: f32[32,32], index: 1, kind: input, shape index: {}]   ;;  %s236_s2 = inlined_call_operand.vmem [shape: f32[1,32], index: 2, kind: input, shape index: {}]   ;;  %s237_s0 = inlined_call_operand.vmem [shape: f32[16,32], index: 0, kind: input, shape index: {}]   ;;  %s238_s3 = inlined_call_operand.vmem [shape: f32[16,32], index: 3, kind: input, shape index: {}]   ;;  %s239_s4 = inlined_call_operand.vmem [shape: f32[1,32], index: 4, kind: input, shape index: {}]   ;;  %s240_s5 = inlined_call_operand.vmem [shape: f32[1,32], index: 5, kind: input, shape index: {}]   ;;  %s241_s6 = inlined_call_operand.vmem [shape: f32[16,32], index: 6, kind: output, shape index: {}]  }
   0x1   :  { %v28_v0 = vld [vmem:[%s235_s1 + $0x18] sm:$0xff]  ;;  %v27_v1 = vld [vmem:[%s235_s1 + $0x10] sm:$0xff]  ;;  %v26_v2 = vld [vmem:[%s235_s1 + $0x8] sm:$0xff]  ;;  %146 = vrcp.f32 %v152_v17 }
   0x2   :  { %52 = vmatpush.msra.mxu0 %v28_v0  ;;  %138 = vmatpush.msra.mxu1 %v28_v0  ;;  %v25_v3 = vld [vmem:[%s235_s1] sm:$0xff]  ;;  %v24_v5 = vld [vmem:[%s237_s0 + $0x8] sm:$0xff] }
   0x3   :  { %v23_v4 = vld [vmem:[%s237_s0] sm:$0xff]  ;;  %v64_v13 = vld [vmem:[%s238_s3 + $0x8] sm:$0xff] }
   0x4   :  { %53 = vmatpush.msra.mxu0 %v27_v1  ;;  %139 = vmatpush.msra.mxu1 %v27_v1  ;;  %v143_v6 = vld [vmem:[%s236_s2] ss:$0 sm:$0xff] }
   0x5   :  { %v63_v8 = vld [vmem:[%s238_s3] sm:$0xff] }
   0x6   :  { %54 = vmatpush.msra.mxu0 %v26_v2  ;;  %140 = vmatpush.msra.mxu1 %v26_v2  ;;  %v144_v48 = vld [vmem:[%s239_s4] ss:$0 sm:$0xff] }
   0x7   :  { %v147_v18 = vpop.eup %146  ;;  %v145_v51 = vld [vmem:[%s240_s5] ss:$0 sm:$0xff] }
   0x8   :  { %55 = vmatpush.msra.mxu0 %v25_v3  ;;  %141 = vmatpush.msra.mxu1 %v25_v3  ;;  %v74_v19 = vmul.f32 32.0, %v147_v18  ;;  %vm78_vm1 = vweird.f32 %v147_v18 }
   0x9   :  { %136 = vmatmul.msk.f32.vlgmr.msra.gmra.mxu0 %vm33_vm0, %v23_v4  ;;  %137 = vmatmul.msk.f32.vlgmr.msra.gmra.mxu1 %vm33_vm0, %v24_v5 }
   0xa   :  { %v75_v20 = vsub.f32 1.0, %v74_v19 }
   0xc   :  { %v76_v21 = vmul.f32 %v147_v18, %v75_v20 }
   0xe   :  { %v77_v22 = vadd.f32 %v147_v18, %v76_v21 }
  0x10   :  { %v79_v23 = vsel %vm78_vm1, %v147_v18, %v77_v22 }
  0x86   :  { %v57_v7 = vpop.f32.mrf.mxu0  ;;  %v60_v9 = vpop.f32.mrf.mxu1 }
  0x87   :  { %v58_v10 = vadd.f32 %v143_v6, %v57_v7  ;;  %v61_v12 = vadd.f32 %v143_v6, %v60_v9 }
  0x89   :  { %v65_v11 = vadd.f32 %v63_v8, %v58_v10  ;;  %v66_v15 = vadd.f32 %v64_v13, %v61_v12 }
  0x8b   :  { %v67_v14 = vsel %vm33_vm0, %v65_v11, 0.0  ;;  %v70_v16 = vsel %vm33_vm0, %v66_v15, 0.0 }
  0x8c   :  { %68 = vadd.xlane.f32.xlu0 %v67_v14 }
  0x94   :  { %71 = vadd.xlane.f32.xlu0 %v70_v16 }
  0xff   :  { %v69_v24 = vpop.xlane.xlu0 %68 }
 0x100   :  { %v80_v25 = vmul.f32 %v79_v23, %v69_v24 }
 0x102   :  { %v82_v26 = vsub.f32 %v65_v11, %v80_v25 }
 0x104   :  { %v84_v27 = vmul.f32 %v82_v26, %v82_v26 }
 0x106   :  { %v86_v28 = vsel %vm33_vm0, %v84_v27, 0.0 }
 0x107   :  { %87 = vadd.xlane.f32.xlu1 %v86_v28  ;;  %v72_v29 = vpop.xlane.xlu0 %71 }
 0x108   :  { %v81_v30 = vmul.f32 %v79_v23, %v72_v29 }
 0x10a   :  { %v83_v31 = vsub.f32 %v66_v15, %v81_v30 }
 0x10c   :  { %v85_v32 = vmul.f32 %v83_v31, %v83_v31 }
 0x10e   :  { %v89_v33 = vsel %vm33_vm0, %v85_v32, 0.0 }
 0x10f   :  { %90 = vadd.xlane.f32.xlu1 %v89_v33 }
 0x17a   :  { %v88_v34 = vpop.xlane.xlu1 %87 }
 0x17b   :  { %v92_v35 = vmul.f32 %v88_v34, %v79_v23 }
 0x17d   :  { %v94_v36 = vadd.f32 1e-05, %v92_v35 }
 0x17f   :  { %148 = vrsqrt.f32 %v94_v36  ;;  %vm102_vm3 = vweird.f32 %v94_v36 }
 0x182   :  { %v91_v37 = vpop.xlane.xlu1 %90 }
 0x183   :  { %v93_v38 = vmul.f32 %v91_v37, %v79_v23 }
 0x185   :  { %v149_v39 = vpop.eup %148  ;;  %v95_v40 = vadd.f32 1e-05, %v93_v38 }
 0x186   :  { %v97_v41 = vmul.f32 %v149_v39, %v94_v36  ;;  %vm103_vm2 = vweird.f32 %v149_v39 }
 0x187   :  { %150 = vrsqrt.f32 %v95_v40  ;;  %vm104_vm4 = vmor %vm102_vm3, %vm103_vm2  ;;  %vm112_vm6 = vweird.f32 %v95_v40 }
 0x188   :  { %v98_v42 = vmul.f32 %v149_v39, %v97_v41 }
 0x18a   :  { %v99_v43 = vmul.f32 0.5, %v98_v42 }
 0x18c   :  { %v100_v44 = vsub.f32 1.5, %v99_v43 }
 0x18d   :  { %v151_v45 = vpop.eup %150 }
 0x18e   :  { %v101_v46 = vmul.f32 %v149_v39, %v100_v44  ;;  %v107_v47 = vmul.f32 %v151_v45, %v95_v40  ;;  %vm113_vm5 = vweird.f32 %v151_v45 }
 0x18f   :  { %vm114_vm7 = vmor %vm112_vm6, %vm113_vm5 }
 0x190   :  { %v105_v49 = vsel %vm104_vm4, %v149_v39, %v101_v46  ;;  %v108_v50 = vmul.f32 %v151_v45, %v107_v47 }
 0x191   :  { %v116_v52 = vmul.f32 %v105_v49, %v82_v26 }
 0x192   :  { %v109_v53 = vmul.f32 0.5, %v108_v50 }
 0x193   :  { %v122_v54 = vmul.f32 %v144_v48, %v116_v52 }
 0x194   :  { %v110_v55 = vsub.f32 1.5, %v109_v53 }
 0x195   :  { %v128_v56 = vadd.f32 %v145_v51, %v122_v54 }
 0x196   :  { %v111_v57 = vmul.f32 %v151_v45, %v110_v55 }
 0x197   :  { %130 = vst.msk [vmem:[%s241_s6] sm:$0xff] %vm33_vm0, %v128_v56 }
 0x198   :  { %v115_v58 = vsel %vm114_vm7, %v151_v45, %v111_v57 }
 0x199   :  { %v117_v59 = vmul.f32 %v115_v58, %v83_v31 }
 0x19b   :  { %v123_v60 = vmul.f32 %v144_v48, %v117_v59 }
 0x19d   :  { %v129_v61 = vadd.f32 %v145_v51, %v123_v60 }
 0x19f   :  { %131 = vst.msk [vmem:[%s241_s6 + $0x8] sm:$0xff] %vm33_vm0, %v129_v61 }

// kernel: transformer_decoder_forward.18
= control target key start
LH: loop header
LB: loop body
LE: loop exit
PB: predicated region body
PF: predicated region fallthrough
CT: control target
= control target key end

     0   :  { %s601_s9 = smov 0   ;;  %s658_s0 = inlined_call_operand.vmem [shape: f32[2,8,96], index: 0, kind: input, shape index: {}]   ;;  %s659_s1 = inlined_call_operand.vmem [shape: f32[2,8,8], index: 1, kind: input, shape index: {}]   ;;  %s660_s2 = inlined_call_operand.vmem [shape: f32[2,8,32], index: 2, kind: output, shape index: {}]  }
   0x1 LB: > { %s504_s10 = sadd.s32 4294967295, %s570_s9   ;;  %p508_p0 = scmp.ge.s32.totalorder %s570_s9, 1  ;;  %s570_s9 = sphi %s601_s9, %s12_s9  }
   0x2   : > { %p120_p1 = scmp.lt.s32.totalorder %s570_s9, 3 }
   0x4   : > { %p121_p2 = pnand %p508_p0, %p120_p1 }
   0x5   : > { %p144_p3 = scmp.lt.s32.totalorder (!%p121_p2), %s504_s10, 1  ;;  %s572_s15 = smov (!%p121_p2), 88  }
   0x6   : > { %124 = sbr.rel (%p121_p2) target bundleno = 918 (0x396), region = 28  ;;  %s573_s16 = smov (!%p121_p2), 96  }
   0x7   : > { %s574_s17 = smov (!%p121_p2), 120   ;;  %s575_s18 = smov (!%p121_p2), 64  }
   0x8   : > { %s576_s19 = smov (!%p121_p2), 72   ;;  %s577_s20 = smov (!%p121_p2), 80  }
   0x9   : > { %s578_s21 = smov (!%p121_p2), 104   ;;  %s579_s22 = smov (!%p121_p2), 112  }
   0xa   : > { %s580_s26 = smov (!%p121_p2), 56   ;;  %s581_s27 = smov (!%p121_p2), 48  }
   0xb   : > { %s662_s10 = smov (!%p144_p3, %s504_s10), 1  ;;  %vm162_vm0 = vcmask 64512   ;;  %s582_s28 = smov 40   ;;  %vm433_vm1 = vcmask 130048   ;;  %vm435_vm2 = vcmask 195584   ;;  %vm437_vm3 = vcmask 261120  }
   0xc   : > { %s609_s11 = sshll.u32 %s662_s10, 3  ;;  %s583_s29 = smov 8  }
   0xd   : > { %s147_s14 = scalar_lea.vmem %s658_s0, %s609_s11  ;;  %s151_s25 = scalar_lea.vmem %s659_s1, %s609_s11 }
   0xe   : > { %v615_v0 = vld [vmem:[%s147_s14] sm:$0xff]  ;;  %s584_s30 = smov 16   ;;  %s585_s3 = smov 24  }
   0xf   : > { %227 = vrot.lane.b32.xlu1 %v615_v0, %s572_s15  ;;  %160 = vrot.lane.b32.xlu0 %v615_v0, %s573_s16  ;;  %v158_v1 = vmul.f32 0.17677669, %v615_v0  ;;  %v157_v7 = vld [vmem:[%s151_s25] sm:$0xff]  ;;  %s155_s6 = scalar_lea.vmem %s660_s2, %s609_s11 }
  0x10   : > { %197 = vrot.lane.b32.xlu2 %v615_v0, %s575_s18 }
  0x17   : > { %225 = vrot.lane.b32.xlu1 %v158_v1, %s574_s17 }
  0x18   : > { %292 = vrot.lane.b32.xlu2 %v615_v0, %s577_s20 }
  0x1f   : > { %357 = vrot.lane.b32.xlu1 %v615_v0, %s576_s19 }
  0x20   : > { %290 = vrot.lane.b32.xlu2 %v158_v1, %s579_s22 }
  0x27   : > { %355 = vrot.lane.b32.xlu1 %v158_v1, %s578_s21 }
  0x6a   : > { %v198_v13 = vpop.permute.xlu2 %197 }
  0x6b   : > { %218 = vmatpush.msra.mxu1 %v198_v13 }
  0x72   : > { %v293_v16 = vpop.permute.xlu2 %292 }
  0x73   : > { %518 = vmatpush.xpose.msk.msrb.mxu1 %vm162_vm0, %v293_v16 }
  0x7a   : > { %v291_v21 = vpop.permute.xlu2 %290 }
  0x81   : > { %v228_v2 = vpop.permute.xlu1 %227  ;;  %v161_v3 = vpop.permute.xlu0 %160 }
  0x82   : > { %512 = vmatpush.xpose.msk.msra.mxu0 %vm162_vm0, %v161_v3  ;;  %515 = vmatpush.xpose.msk.msra.mxu2 %vm162_vm0, %v228_v2 }
  0x85   : > { %513 = vmatmul.msk.f32.vlgmr.msra.gmra.mxu0 %vm162_vm0, %v158_v1 }
  0x89   : > { %v226_v4 = vpop.permute.xlu1 %225 }
  0x8a   : > { %516 = vmatmul.msk.f32.vlgmr.msra.gmra.mxu2 %vm162_vm0, %v226_v4 }
  0x91   : > { %v358_v5 = vpop.permute.xlu1 %357 }
  0x92   : > { %521 = vmatpush.xpose.msk.msrb.mxu0 %vm162_vm0, %v358_v5 }
  0x99   : > { %v356_v6 = vpop.permute.xlu1 %355 }
  0x9a   : > { %522 = vmatmul.msk.f32.vlgmr.msrb.gmra.mxu0 %vm162_vm0, %v356_v6 }
 0x102   : > { %v185_v8 = vpop.f32.mrf.mxu0 }
 0x103   : > { %v186_v9 = vadd.f32 %v185_v8, %v157_v7 }
 0x105   : > { %v188_v10 = vsel %vm162_vm0, %v186_v9, -inf }
 0x106   : > { %189 = vmax.xlane.f32.xlu0 %v188_v10 }
 0x10d   : > { %v250_v11 = vpop.f32.mrf.mxu2 }
 0x10e   : > { %v251_v12 = vadd.f32 %v250_v11, %v157_v7 }
 0x110   : > { %v253_v14 = vsel %vm162_vm0, %v251_v12, -inf }
 0x111   : > { %254 = vmax.xlane.f32.xlu2 %v253_v14 }
 0x117   : > { %v380_v15 = vpop.f32.mrf.mxu0 }
 0x118   : > { %v381_v17 = vadd.f32 %v380_v15, %v157_v7 }
 0x11a   : > { %v383_v18 = vsel %vm162_vm0, %v381_v17, -inf }
 0x11b   : > { %384 = vmax.xlane.f32.xlu0 %v383_v18 }
 0x129   : > { %327 = vrot.lane.b32.xlu2 %v615_v0, %s581_s27 }
 0x12f   : > { %262 = vrot.lane.b32.xlu0 %v615_v0, %s580_s26 }
 0x179   : > { %v190_v19 = vpop.xlane.xlu0 %189 }
 0x17a   : > { %v191_v20 = vsub.f32 %v186_v9, %v190_v19 }
 0x17c   : > { %v192_v22 = vmul.f32 1.442695, %v191_v20 }
 0x17e   : > { %548 = vpow2.f32 %v192_v22 }
 0x184   : > { %v549_v23 = vpop.eup %548  ;;  %v255_v24 = vpop.xlane.xlu2 %254 }
 0x185   : > { %v256_v25 = vsub.f32 %v251_v12, %v255_v24  ;;  %514 = vmatmul.msk.f32.vlgmr.msra.gmra.mxu1 %vm162_vm0, %v549_v23  ;;  %v194_v30 = vsel %vm162_vm0, %v549_v23, 0.0 }
 0x187   : > { %v257_v26 = vmul.f32 1.442695, %v256_v25 }
 0x189   : > { %550 = vpow2.f32 %v257_v26 }
 0x18c   : > { %v328_v44 = vpop.permute.xlu2 %327 }
 0x18d   : > { %519 = vmatmul.msk.f32.vlgmr.msrb.gmra.mxu1 %vm162_vm0, %v291_v21 }
 0x18e   : > { %v385_v29 = vpop.xlane.xlu0 %384 }
 0x18f   : > { %v551_v27 = vpop.eup %550  ;;  %v386_v40 = vsub.f32 %v381_v17, %v385_v29 }
 0x190   : > { %v259_v28 = vsel %vm162_vm0, %v551_v27, 0.0 }
 0x191   : > { %260 = vadd.xlane.f32.xlu0 %v259_v28  ;;  %v387_v41 = vmul.f32 1.442695, %v386_v40 }
 0x199   : > { %195 = vadd.xlane.f32.xlu0 %v194_v30 }
 0x1a1   : > { %v263_v31 = vpop.permute.xlu0 %262 }
 0x1a2   : > { %283 = vmatpush.msra.mxu3 %v263_v31 }
 0x1a3   : > { %517 = vmatmul.msk.f32.vlgmr.msra.gmra.mxu3 %vm162_vm0, %v551_v27 }
 0x1a4   : > { %348 = vmatpush.msrb.mxu3 %v328_v44 }
 0x202   : > { %v220_v32 = vpop.f32.mrf.mxu1 }
 0x204   : > { %v261_v36 = vpop.xlane.xlu0 %260 }
 0x205   : > { %552 = vrcp.f32 %v261_v36 }
 0x206   : > { %554 = vpow2.f32 %v387_v41 }
 0x20a   : > { %v315_v33 = vpop.f32.mrf.mxu1 }
 0x20b   : > { %v316_v34 = vadd.f32 %v315_v33, %v157_v7  ;;  %v553_v37 = vpop.eup %552 }
 0x20c   : > { %v555_v42 = vpop.eup %554  ;;  %v196_v59 = vpop.xlane.xlu0 %195 }
 0x20d   : > { %v318_v35 = vsel %vm162_vm0, %v316_v34, -inf  ;;  %v389_v43 = vsel %vm162_vm0, %v555_v42, 0.0 }
 0x20e   : > { %319 = vmax.xlane.f32.xlu1 %v318_v35 }
 0x226   : > { %v285_v38 = vpop.f32.mrf.mxu3 }
 0x227   : > { %v289_v39 = vmul.f32 %v553_v37, %v285_v38  ;;  %392 = vrot.lane.b32.xlu1 %v615_v0, %s582_s28 }
 0x229   : > { %421 = vrot.lane.b32.xlu0 %v289_v39, %s583_s29 }
 0x251   : > { %390 = vadd.xlane.f32.xlu1 %v389_v43 }
 0x281   : > { %v320_v45 = vpop.xlane.xlu1 %319 }
 0x282   : > { %v321_v46 = vsub.f32 %v316_v34, %v320_v45 }
 0x284   : > { %v322_v47 = vmul.f32 1.442695, %v321_v46 }
 0x286   : > { %556 = vpow2.f32 %v322_v47 }
 0x28c   : > { %v557_v48 = vpop.eup %556 }
 0x28d   : > { %520 = vmatmul.msk.f32.vlgmr.msrb.gmra.mxu3 %vm162_vm0, %v557_v48  ;;  %v324_v49 = vsel %vm162_vm0, %v557_v48, 0.0 }
 0x28e   : > { %325 = vadd.xlane.f32.xlu2 %v324_v49 }
 0x299   : > { %v393_v50 = vpop.permute.xlu1 %392 }
 0x29a   : > { %413 = vmatpush.msrb.mxu2 %v393_v50 }
 0x29b   : > { %523 = vmatmul.msk.f32.vlgmr.msrb.gmra.mxu2 %vm162_vm0, %v555_v42  ;;  %v422_v61 = vpop.permute.xlu0 %421 }
 0x2c4   : > { %v391_v55 = vpop.xlane.xlu1 %390 }
 0x301   : > { %v326_v51 = vpop.xlane.xlu2 %325 }
 0x302   : > { %558 = vrcp.f32 %v326_v51 }
 0x303   : > { %560 = vrcp.f32 %v391_v55 }
 0x304   : > { %562 = vrcp.f32 %v196_v59 }
 0x308   : > { %v559_v52 = vpop.eup %558 }
 0x309   : > { %v561_v56 = vpop.eup %560 }
 0x30a   : > { %v563_v60 = vpop.eup %562 }
 0x30b   : > { %v224_v62 = vmul.f32 %v563_v60, %v220_v32 }
 0x30d   : > { %v432_v0 = vsel %vm162_vm0, %v224_v62, %v422_v61 }
 0x310   : > { %v350_v53 = vpop.f32.mrf.mxu3 }
 0x311   : > { %v354_v54 = vmul.f32 %v559_v52, %v350_v53 }
 0x313   : > { %425 = vrot.lane.b32.xlu2 %v354_v54, %s584_s30 }
 0x31e   : > { %v415_v57 = vpop.f32.mrf.mxu2 }
 0x31f   : > { %v419_v58 = vmul.f32 %v561_v56, %v415_v57 }
 0x321   : > { %429 = vrot.lane.b32.xlu1 %v419_v58, %s585_s3 }
 0x36d   : > { %v426_v63 = vpop.permute.xlu2 %425 }
 0x36e   : > { %v434_v1 = vsel %vm433_vm1, %v432_v0, %v426_v63 }
 0x393   : > { %v430_v2 = vpop.permute.xlu1 %429 }
 0x394   : > { %v436_v3 = vsel %vm435_vm2, %v434_v1, %v430_v2 }
 0x395   : > { %438 = vst.msk [vmem:[%s155_s6] sm:$0xff] %vm437_vm3, %v436_v3 }
 0x396 PF: > { %s12_s9 = sadd.s32 1, %s570_s9  }
 0x397   : > { %p9_p4 = scmp.ge.s32.totalorder %s12_s9, 4  }
 0x399   :  { %11 = sbr.rel (!%p9_p4) target bundleno = 1 (0x1), region = 61 }

// kernel: transformer_decoder_forward.21
= control target key start
LH: loop header
LB: loop body
LE: loop exit
PB: predicated region body
PF: predicated region fallthrough
CT: control target
= control target key end

     0   :  { %vm22_vm0 = vcmask 523264   ;;  %vm39_vm1 = vcmask 261120   ;;  %s197_s1 = inlined_call_operand.vmem [shape: f32[32,64], index: 1, kind: input, shape index: {}]   ;;  %s198_s2 = inlined_call_operand.vmem [shape: f32[1,64], index: 2, kind: input, shape index: {}]   ;;  %s199_s0 = inlined_call_operand.vmem [shape: f32[32,32], index: 0, kind: input, shape index: {}]   ;;  %s200_s3 = inlined_call_operand.vmem [shape: f32[32,64], index: 3, kind: output, shape index: {}]  }
   0x1   :  { %v38_v0 = vld [vmem:[%s197_s1 + $0x18] sm:$0xff]  ;;  %v37_v1 = vld [vmem:[%s197_s1 + $0x10] sm:$0xff]  ;;  %v36_v2 = vld [vmem:[%s197_s1 + $0x8] sm:$0xff] }
   0x2   :  { %110 = vmatpush.msra.mxu2 %v38_v0  ;;  %111 = vmatpush.msra.mxu3 %v38_v0  ;;  %v121_v3 = vld [vmem:[%s198_s2] ss:$0 sm:$0xff]  ;;  %v33_v5 = vld [vmem:[%s199_s0 + $0x10] sm:$0xff]  ;;  %v34_v6 = vld [vmem:[%s199_s0 + $0x18] sm:$0xff] }
   0x3   :  { %64 = vmatpush.msra.mxu0 %v38_v0  ;;  %109 = vmatpush.msra.mxu1 %v38_v0  ;;  %v35_v4 = vld [vmem:[%s197_s1] sm:$0xff]  ;;  %23 = vst.msk [vmem:[#allocation2] sm:$0xff] %vm22_vm0, %v121_v3  ;;  %v32_v8 = vld [vmem:[%s199_s0 + $0x8] sm:$0xff] }
   0x4   :  { %113 = vmatpush.msra.mxu2 %v37_v1  ;;  %114 = vmatpush.msra.mxu3 %v37_v1  ;;  %24 = vst.msk [vmem:[#allocation2 + $0x8] sm:$0xff] %vm22_vm0, %v121_v3  ;;  %v31_v7 = vld [vmem:[%s199_s0] sm:$0xff] }
   0x5   :  { %65 = vmatpush.msra.mxu0 %v37_v1  ;;  %112 = vmatpush.msra.mxu1 %v37_v1  ;;  %25 = vst.msk [vmem:[#allocation2 + $0x10] sm:$0xff] %vm22_vm0, %v121_v3 }
   0x6   :  { %116 = vmatpush.msra.mxu2 %v36_v2  ;;  %117 = vmatpush.msra.mxu3 %v36_v2  ;;  %26 = vst.msk [vmem:[#allocation2 + $0x18] sm:$0xff] %vm22_vm0, %v121_v3 }
   0x7   :  { %66 = vmatpush.msra.mxu0 %v36_v2  ;;  %115 = vmatpush.msra.mxu1 %v36_v2 }
   0x8   :  { %119 = vmatpush.msra.mxu2 %v35_v4  ;;  %120 = vmatpush.msra.mxu3 %v35_v4 }
   0x9   :  { %107 = vmatmul.msk.f32.vlgmr.msra.gmra.mxu2 %vm39_vm1, %v33_v5  ;;  %108 = vmatmul.msk.f32.vlgmr.msra.gmra.mxu3 %vm39_vm1, %v34_v6 }
   0xa   :  { %67 = vmatpush.msra.mxu0 %v35_v4  ;;  %118 = vmatpush.msra.mxu1 %v35_v4  ;;  %v27_v9 = vld [vmem:[#allocation2] sm:$0xff] }
   0xb   :  { %105 = vmatmul.msk.f32.vlgmr.msra.gmra.mxu0 %vm39_vm1, %v31_v7  ;;  %106 = vmatmul.msk.f32.vlgmr.msra.gmra.mxu1 %vm39_vm1, %v32_v8  ;;  %v28_v10 = vld [vmem:[#allocation2 + $0x8] sm:$0xff] }
   0xc   :  { %v29_v15 = vld [vmem:[#allocation2 + $0x10] sm:$0xff] }
   0xd   :  { %v30_v16 = vld [vmem:[#allocation2 + $0x18] sm:$0xff] }
  0x88   :  { %v69_v11 = vpop.f32.mrf.mxu0  ;;  %v72_v12 = vpop.f32.mrf.mxu1 }
  0x89   :  { %v81_v13 = vadd.f32 %v69_v11, %v27_v9  ;;  %v82_v14 = vadd.f32 %v72_v12, %v28_v10 }
  0x8b   :  { %86 = vst.msk [vmem:[#allocation2] sm:$0xff] %vm22_vm0, %v81_v13 }
  0x8c   :  { %87 = vst.msk [vmem:[#allocation2 + $0x8] sm:$0xff] %vm22_vm0, %v82_v14  ;;  %v75_v17 = vpop.f32.mrf.mxu2  ;;  %v78_v18 = vpop.f32.mrf.mxu3 }
  0x8d   :  { %v83_v19 = vadd.f32 %v75_v17, %v29_v15  ;;  %v84_v20 = vadd.f32 %v78_v18, %v30_v16 }
  0x8f   :  { %88 = vst.msk [vmem:[#allocation2 + $0x10] sm:$0xff] %vm22_vm0, %v83_v19 }
  0x90   :  { %89 = vst.msk [vmem:[#allocation2 + $0x18] sm:$0xff] %vm22_vm0, %v84_v20 }
  0x92   :  { %v93_v21 = vld [vmem:[#allocation2] sm:$0xff] }
  0x93   :  { %97 = vst.msk [vmem:[%s200_s3] sm:$0xff] %vm22_vm0, %v93_v21  ;;  %v94_v22 = vld [vmem:[#allocation2 + $0x8] sm:$0xff] }
  0x94   :  { %98 = vst.msk [vmem:[%s200_s3 + $0x8] sm:$0xff] %vm22_vm0, %v94_v22 }
  0x96   :  { %v95_v23 = vld [vmem:[#allocation2 + $0x10] sm:$0xff] }
  0x97   :  { %99 = vst.msk [vmem:[%s200_s3 + $0x10] sm:$0xff] %vm22_vm0, %v95_v23  ;;  %v96_v24 = vld [vmem:[#allocation2 + $0x18] sm:$0xff] }
  0x98   :  { %100 = vst.msk [vmem:[%s200_s3 + $0x18] sm:$0xff] %vm22_vm0, %v96_v24 }

// kernel: transformer_decoder_forward.29
= control target key start
LH: loop header
LB: loop body
LE: loop exit
PB: predicated region body
PF: predicated region fallthrough
CT: control target
= control target key end

     0   :  { %8 = vsyncpa [#allocation4], 0  ;;  %s168_s15 = smov [#allocation3]   ;;  %s169_s17 = smov 128   ;;  %s237_s0 = inlined_call_operand.vmem [shape: f32[32,32], index: 0, kind: input, shape index: {}]   ;;  %s238_s1 = inlined_call_operand.hbm [shape: f32[32,64], index: 1, kind: input, shape index: {}]   ;;  %s239_s2 = inlined_call_operand.vmem [shape: f32[1,64], index: 2, kind: input, shape index: {}]   ;;  %s240_s3 = inlined_call_operand.vmem [shape: f32[32,64], index: 3, kind: output, shape index: {}]  }
   0x1   :  { %s15_s14 = sshll.u32 %s238_s1, 4  ;;  %s17_s16 = sshll.u32 %s168_s15, 4  ;;  %s16_s14 = int_to_ptr.hbm [resolvable:$true] %s15_s14  ;;  %s18_s16 = int_to_ptr.vmem [resolvable:$true] %s17_s16 }
   0x2   :  { %s170_s18 = smov 8  }
   0x3   :  { %23 = dma.hbm_to_vmem [thread:$0]  %s16_s14, 512, %s18_s16, [#allocation4], %s169_s17, %s169_s17, %s170_s18  }
   0x4   :  { %166 = dma.done.wait [#allocation4], 512  }
   0x5   :  { %167 = vsyncadd [#allocation4], 4294966784  ;;  %v54_v0 = vld [vmem:[#allocation3 + $0x18] sm:$0xff]  ;;  %v53_v1 = vld [vmem:[#allocation3 + $0x10] sm:$0xff]  ;;  %vm38_vm0 = vcmask 523264   ;;  %vm55_vm1 = vcmask 261120  }
   0x6   :  { %127 = vmatpush.msra.mxu2 %v54_v0  ;;  %128 = vmatpush.msra.mxu3 %v54_v0  ;;  %v52_v2 = vld [vmem:[#allocation3 + $0x8] sm:$0xff]  ;;  %v141_v3 = vld [vmem:[%s239_s2] ss:$0 sm:$0xff]  ;;  %v49_v5 = vld [vmem:[%s237_s0 + $0x10] sm:$0xff] }
   0x7   :  { %80 = vmatpush.msra.mxu0 %v54_v0  ;;  %126 = vmatpush.msra.mxu1 %v54_v0  ;;  %v51_v4 = vld [vmem:[#allocation3] sm:$0xff]  ;;  %v50_v6 = vld [vmem:[%s237_s0 + $0x18] sm:$0xff]  ;;  %39 = vst.msk [vmem:[#allocation2] sm:$0xff] %vm38_vm0, %v141_v3  ;;  %v48_v8 = vld [vmem:[%s237_s0 + $0x8] sm:$0xff] }
   0x8   :  { %130 = vmatpush.msra.mxu2 %v53_v1  ;;  %131 = vmatpush.msra.mxu3 %v53_v1  ;;  %40 = vst.msk [vmem:[#allocation2 + $0x8] sm:$0xff] %vm38_vm0, %v141_v3  ;;  %v47_v7 = vld [vmem:[%s237_s0] sm:$0xff] }
   0x9   :  { %81 = vmatpush.msra.mxu0 %v53_v1  ;;  %129 = vmatpush.msra.mxu1 %v53_v1  ;;  %41 = vst.msk [vmem:[#allocation2 + $0x10] sm:$0xff] %vm38_vm0, %v141_v3 }
   0xa   :  { %133 = vmatpush.msra.mxu2 %v52_v2  ;;  %134 = vmatpush.msra.mxu3 %v52_v2  ;;  %42 = vst.msk [vmem:[#allocation2 + $0x18] sm:$0xff] %vm38_vm0, %v141_v3 }
   0xb   :  { %82 = vmatpush.msra.mxu0 %v52_v2  ;;  %132 = vmatpush.msra.mxu1 %v52_v2 }
   0xc   :  { %136 = vmatpush.msra.mxu2 %v51_v4  ;;  %137 = vmatpush.msra.mxu3 %v51_v4 }
   0xd   :  { %124 = vmatmul.msk.f32.vlgmr.msra.gmra.mxu2 %vm55_vm1, %v49_v5  ;;  %125 = vmatmul.msk.f32.vlgmr.msra.gmra.mxu3 %vm55_vm1, %v50_v6 }
   0xe   :  { %83 = vmatpush.msra.mxu0 %v51_v4  ;;  %135 = vmatpush.msra.mxu1 %v51_v4  ;;  %v43_v9 = vld [vmem:[#allocation2] sm:$0xff] }
   0xf   :  { %122 = vmatmul.msk.f32.vlgmr.msra.gmra.mxu0 %vm55_vm1, %v47_v7  ;;  %123 = vmatmul.msk.f32.vlgmr.msra.gmra.mxu1 %vm55_vm1, %v48_v8  ;;  %v44_v10 = vld [vmem:[#allocation2 + $0x8] sm:$0xff] }
  0x10   :  { %v45_v15 = vld [vmem:[#allocation2 + $0x10] sm:$0xff] }
  0x11   :  { %v46_v16 = vld [vmem:[#allocation2 + $0x18] sm:$0xff] }
  0x8c   :  { %v85_v11 = vpop.f32.mrf.mxu0  ;;  %v88_v12 = vpop.f32.mrf.mxu1 }
  0x8d   :  { %v97_v13 = vadd.f32 %v85_v11, %v43_v9  ;;  %v98_v14 = vadd.f32 %v88_v12, %v44_v10 }
  0x8f   :  { %102 = vst.msk [vmem:[#allocation2] sm:$0xff] %vm38_vm0, %v97_v13 }
  0x90   :  { %103 = vst.msk [vmem:[#allocation2 + $0x8] sm:$0xff] %vm38_vm0, %v98_v14  ;;  %v91_v17 = vpop.f32.mrf.mxu2  ;;  %v94_v18 = vpop.f32.mrf.mxu3 }
  0x91   :  { %v99_v19 = vadd.f32 %v91_v17, %v45_v15  ;;  %v100_v20 = vadd.f32 %v94_v18, %v46_v16 }
  0x93   :  { %104 = vst.msk [vmem:[#allocation2 + $0x10] sm:$0xff] %vm38_vm0, %v99_v19 }
  0x94   :  { %105 = vst.msk [vmem:[#allocation2 + $0x18] sm:$0xff] %vm38_vm0, %v100_v20 }
  0x96   :  { %v109_v21 = vld [vmem:[#allocation2] sm:$0xff] }
  0x97   :  { %113 = vst.msk [vmem:[%s240_s3] sm:$0xff] %vm38_vm0, %v109_v21  ;;  %v110_v22 = vld [vmem:[#allocation2 + $0x8] sm:$0xff] }
  0x98   :  { %114 = vst.msk [vmem:[%s240_s3 + $0x8] sm:$0xff] %vm38_vm0, %v110_v22 }
  0x9a   :  { %v111_v23 = vld [vmem:[#allocation2 + $0x10] sm:$0xff] }
  0x9b   :  { %115 = vst.msk [vmem:[%s240_s3 + $0x10] sm:$0xff] %vm38_vm0, %v111_v23  ;;  %v112_v24 = vld [vmem:[#allocation2 + $0x18] sm:$0xff] }
  0x9c   :  { %116 = vst.msk [vmem:[%s240_s3 + $0x18] sm:$0xff] %vm38_vm0, %v112_v24 }
  0x9d   :  { %121 = vsyncpa [#allocation4], 1 }

// kernel: transformer_decoder_forward.24
= control target key start
LH: loop header
LB: loop body
LE: loop exit
PB: predicated region body
PF: predicated region fallthrough
CT: control target
= control target key end

     0   :  { %vm36_vm0 = vcmask 261120   ;;  %vm80_vm1 = vcmask 523264   ;;  %v210_v32 = vmov 32.0   ;;  %s319_s1 = inlined_call_operand.vmem [shape: f32[32,64], index: 1, kind: input, shape index: {}]   ;;  %s320_s3 = inlined_call_operand.vmem [shape: f32[64,32], index: 3, kind: input, shape index: {}]   ;;  %s321_s0 = inlined_call_operand.vmem [shape: f32[16,32], index: 0, kind: input, shape index: {}]   ;;  %s322_s2 = inlined_call_operand.vmem [shape: f32[1,64], index: 2, kind: input, shape index: {}]   ;;  %s323_s4 = inlined_call_operand.vmem [shape: f32[1,32], index: 4, kind: input, shape index: {}]   ;;  %s324_s5 = inlined_call_operand.vmem [shape: f32[1,32], index: 5, kind: input, shape index: {}]   ;;  %s325_s6 = inlined_call_operand.vmem [shape: f32[1,32], index: 6, kind: input, shape index: {}]   ;;  %s326_s7 = inlined_call_operand.vmem [shape: f32[16,32], index: 7, kind: output, shape index: {}]  }
   0x1   :  { %v31_v0 = vld [vmem:[%s319_s1 + $0x18] sm:$0xff]  ;;  %v30_v1 = vld [vmem:[%s319_s1 + $0x10] sm:$0xff]  ;;  %v29_v2 = vld [vmem:[%s319_s1 + $0x8] sm:$0xff]  ;;  %204 = vrcp.f32 %v210_v32 }
   0x2   :  { %55 = vmatpush.msra.mxu0 %v31_v0  ;;  %187 = vmatpush.msra.mxu3 %v31_v0  ;;  %v75_v3 = vld [vmem:[%s320_s3 + $0x38] sm:$0xff]  ;;  %v74_v4 = vld [vmem:[%s320_s3 + $0x30] sm:$0xff]  ;;  %v28_v5 = vld [vmem:[%s319_s1] sm:$0xff] }
   0x3   :  { %95 = vmatpush.msra.mxu1 %v75_v3  ;;  %191 = vmatpush.msra.mxu2 %v75_v3  ;;  %v26_v6 = vld [vmem:[%s321_s0] sm:$0xff]  ;;  %v27_v7 = vld [vmem:[%s321_s0 + $0x8] sm:$0xff]  ;;  %v71_v10 = vld [vmem:[%s320_s3 + $0x18] sm:$0xff] }
   0x4   :  { %56 = vmatpush.msra.mxu0 %v30_v1  ;;  %188 = vmatpush.msra.mxu3 %v30_v1  ;;  %v73_v8 = vld [vmem:[%s320_s3 + $0x28] sm:$0xff]  ;;  %v72_v9 = vld [vmem:[%s320_s3 + $0x20] sm:$0xff]  ;;  %v70_v11 = vld [vmem:[%s320_s3 + $0x10] sm:$0xff] }
   0x5   :  { %96 = vmatpush.msra.mxu1 %v74_v4  ;;  %192 = vmatpush.msra.mxu2 %v74_v4  ;;  %v69_v12 = vld [vmem:[%s320_s3 + $0x8] sm:$0xff]  ;;  %v68_v13 = vld [vmem:[%s320_s3] sm:$0xff] }
   0x6   :  { %57 = vmatpush.msra.mxu0 %v29_v2  ;;  %189 = vmatpush.msra.mxu3 %v29_v2  ;;  %v200_v14 = vld [vmem:[%s322_s2] ss:$0 sm:$0xff] }
   0x7   :  { %97 = vmatpush.msra.mxu1 %v73_v8  ;;  %193 = vmatpush.msra.mxu2 %v73_v8  ;;  %v201_v21 = vld [vmem:[%s323_s4] ss:$0 sm:$0xff]  ;;  %v205_v33 = vpop.eup %204 }
   0x8   :  { %58 = vmatpush.msra.mxu0 %v28_v5  ;;  %190 = vmatpush.msra.mxu3 %v28_v5  ;;  %v121_v34 = vmul.f32 32.0, %v205_v33  ;;  %vm125_vm2 = vweird.f32 %v205_v33  ;;  %v202_v61 = vld [vmem:[%s324_s5] ss:$0 sm:$0xff] }
   0x9   :  { %183 = vmatmul.msk.f32.vlgmr.msra.gmra.mxu0 %vm36_vm0, %v26_v6  ;;  %184 = vmatmul.msk.f32.vlgmr.msra.gmra.mxu3 %vm36_vm0, %v27_v7  ;;  %v203_v0 = vld [vmem:[%s325_s6] ss:$0 sm:$0xff] }
   0xa   :  { %98 = vmatpush.msra.mxu1 %v72_v9  ;;  %194 = vmatpush.msra.mxu2 %v72_v9  ;;  %v122_v35 = vsub.f32 1.0, %v121_v34 }
   0xc   :  { %99 = vmatpush.msra.mxu1 %v71_v10  ;;  %195 = vmatpush.msra.mxu2 %v71_v10  ;;  %v123_v36 = vmul.f32 %v205_v33, %v122_v35 }
   0xe   :  { %100 = vmatpush.msra.mxu1 %v70_v11  ;;  %196 = vmatpush.msra.mxu2 %v70_v11  ;;  %v124_v37 = vadd.f32 %v205_v33, %v123_v36 }
  0x10   :  { %101 = vmatpush.msra.mxu1 %v69_v12  ;;  %197 = vmatpush.msra.mxu2 %v69_v12  ;;  %v126_v38 = vsel %vm125_vm2, %v205_v33, %v124_v37 }
  0x12   :  { %102 = vmatpush.msra.mxu1 %v68_v13  ;;  %198 = vmatpush.msra.mxu2 %v68_v13 }
  0x86   :  { %v60_v15 = vpop.f32.mrf.mxu0 }
  0x87   :  { %v61_v16 = vadd.f32 %v200_v14, %v60_v15 }
  0x89   :  { %v66_v17 = vmax.f32 %v61_v16, 0.0 }
  0x8b   :  { %185 = vmatmul.msk.f32.vlgmr.msra.gmra.mxu1 %vm80_vm1, %v66_v17 }
  0x8c   :  { %v63_v18 = vpop.f32.mrf.mxu3 }
  0x8d   :  { %v64_v19 = vadd.f32 %v200_v14, %v63_v18 }
  0x8f   :  { %v67_v20 = vmax.f32 %v64_v19, 0.0 }
  0x91   :  { %186 = vmatmul.msk.f32.vlgmr.msra.gmra.mxu2 %vm80_vm1, %v67_v20 }
 0x108   :  { %v104_v22 = vpop.f32.mrf.mxu1 }
 0x109   :  { %v105_v23 = vadd.f32 %v201_v21, %v104_v22 }
 0x10b   :  { %v110_v24 = vmax.f32 %v105_v23, 0.0 }
 0x10d   :  { %v112_v25 = vadd.f32 %v110_v24, %v26_v6 }
 0x10f   :  { %v114_v26 = vsel %vm36_vm0, %v112_v25, 0.0 }
 0x110   :  { %115 = vadd.xlane.f32.xlu0 %v114_v26 }
 0x114   :  { %v107_v27 = vpop.f32.mrf.mxu2 }
 0x115   :  { %v108_v28 = vadd.f32 %v201_v21, %v107_v27 }
 0x117   :  { %v111_v29 = vmax.f32 %v108_v28, 0.0 }
 0x119   :  { %v113_v30 = vadd.f32 %v111_v29, %v27_v7 }
 0x11b   :  { %v117_v31 = vsel %vm36_vm0, %v113_v30, 0.0 }
 0x11c   :  { %118 = vadd.xlane.f32.xlu0 %v117_v31 }
 0x183   :  { %v116_v39 = vpop.xlane.xlu0 %115 }
 0x184   :  { %v127_v40 = vmul.f32 %v126_v38, %v116_v39 }
 0x186   :  { %v129_v41 = vsub.f32 %v112_v25, %v127_v40 }
 0x188   :  { %v131_v42 = vmul.f32 %v129_v41, %v129_v41 }
 0x18a   :  { %v133_v43 = vsel %vm36_vm0, %v131_v42, 0.0 }
 0x18b   :  { %134 = vadd.xlane.f32.xlu1 %v133_v43 }
 0x18f   :  { %v119_v44 = vpop.xlane.xlu0 %118 }
 0x190   :  { %v128_v45 = vmul.f32 %v126_v38, %v119_v44 }
 0x192   :  { %v130_v46 = vsub.f32 %v113_v30, %v128_v45 }
 0x194   :  { %v132_v47 = vmul.f32 %v130_v46, %v130_v46 }
 0x196   :  { %v136_v48 = vsel %vm36_vm0, %v132_v47, 0.0 }
 0x197   :  { %137 = vadd.xlane.f32.xlu1 %v136_v48 }
 0x1fe   :  { %v135_v49 = vpop.xlane.xlu1 %134 }
 0x1ff   :  { %v139_v50 = vmul.f32 %v135_v49, %v126_v38 }
 0x201   :  { %v141_v51 = vadd.f32 1e-05, %v139_v50 }
 0x203   :  { %206 = vrsqrt.f32 %v141_v51  ;;  %vm149_vm4 = vweird.f32 %v141_v51 }
 0x209   :  { %v207_v52 = vpop.eup %206 }
 0x20a   :  { %v144_v53 = vmul.f32 %v207_v52, %v141_v51  ;;  %v138_v54 = vpop.xlane.xlu1 %137  ;;  %vm150_vm3 = vweird.f32 %v207_v52 }
 0x20b   :  { %v140_v55 = vmul.f32 %v138_v54, %v126_v38  ;;  %vm151_vm5 = vmor %vm149_vm4, %vm150_vm3 }
 0x20c   :  { %v145_v56 = vmul.f32 %v207_v52, %v144_v53 }
 0x20d   :  { %v142_v57 = vadd.f32 1e-05, %v140_v55 }
 0x20e   :  { %v146_v58 = vmul.f32 0.5, %v145_v56 }
 0x20f   :  { %208 = vrsqrt.f32 %v142_v57  ;;  %vm159_vm7 = vweird.f32 %v142_v57 }
 0x210   :  { %v147_v59 = vsub.f32 1.5, %v146_v58 }
 0x212   :  { %v148_v60 = vmul.f32 %v207_v52, %v147_v59 }
 0x214   :  { %v152_v62 = vsel %vm151_vm5, %v207_v52, %v148_v60 }
 0x215   :  { %v209_v63 = vpop.eup %208  ;;  %v163_v1 = vmul.f32 %v152_v62, %v129_v41 }
 0x216   :  { %v154_v2 = vmul.f32 %v209_v63, %v142_v57  ;;  %vm160_vm6 = vweird.f32 %v209_v63 }
 0x217   :  { %v169_v3 = vmul.f32 %v202_v61, %v163_v1  ;;  %vm161_vm8 = vmor %vm159_vm7, %vm160_vm6 }
 0x218   :  { %v155_v4 = vmul.f32 %v209_v63, %v154_v2 }
 0x219   :  { %v175_v5 = vadd.f32 %v203_v0, %v169_v3 }
 0x21a   :  { %v156_v6 = vmul.f32 0.5, %v155_v4 }
 0x21b   :  { %177 = vst.msk [vmem:[%s326_s7] sm:$0xff] %vm36_vm0, %v175_v5 }
 0x21c   :  { %v157_v7 = vsub.f32 1.5, %v156_v6 }
 0x21e   :  { %v158_v8 = vmul.f32 %v209_v63, %v157_v7 }
 0x220   :  { %v162_v9 = vsel %vm161_vm8, %v209_v63, %v158_v8 }
 0x221   :  { %v164_v10 = vmul.f32 %v162_v9, %v130_v46 }
 0x223   :  { %v170_v11 = vmul.f32 %v202_v61, %v164_v10 }
 0x225   :  { %v176_v12 = vadd.f32 %v203_v0, %v170_v11 }
 0x227   :  { %178 = vst.msk [vmem:[%s326_s7 + $0x8] sm:$0xff] %vm36_vm0, %v176_v12 }

// kernel: transformer_decoder_forward.22
= control target key start
LH: loop header
LB: loop body
LE: loop exit
PB: predicated region body
PF: predicated region fallthrough
CT: control target
= control target key end

     0   :  { %s648_s9 = smov 0   ;;  %s708_s0 = inlined_call_operand.vmem [shape: f32[2,8,32], index: 0, kind: input, shape index: {}]   ;;  %s709_s1 = inlined_call_operand.vmem [shape: f32[2,16,64], index: 1, kind: input, shape index: {}]   ;;  %s710_s2 = inlined_call_operand.vmem [shape: f32[2,8,32], index: 2, kind: output, shape index: {}]  }
   0x1 LB: > { %s533_s10 = sadd.s32 4294967295, %s621_s9   ;;  %p537_p0 = scmp.ge.s32.totalorder %s621_s9, 1  ;;  %s621_s9 = sphi %s648_s9, %s12_s9  }
   0x2   : > { %p121_p1 = scmp.lt.s32.totalorder %s621_s9, 3 }
   0x4   : > { %p122_p2 = pnand %p537_p0, %p121_p1 }
   0x5   : > { %p146_p3 = scmp.lt.s32.totalorder (!%p122_p2), %s533_s10, 1  ;;  %s623_s19 = smov (!%p122_p2), 120  }
   0x6   : > { %125 = sbr.rel (%p122_p2) target bundleno = 807 (0x327), region = 28  ;;  %s624_s20 = smov (!%p122_p2), 104  }
   0x7   : > { %s625_s21 = smov (!%p122_p2), 96   ;;  %s626_s22 = smov (!%p122_p2), 112  }
   0x8   : > { %s627_s23 = smov (!%p122_p2), 88   ;;  %s628_s24 = smov (!%p122_p2), 80  }
   0x9   : > { %s629_s25 = smov (!%p122_p2), 72   ;;  %s630_s26 = smov (!%p122_p2), 8  }
   0xa   : > { %s631_s27 = smov (!%p122_p2), 16   ;;  %s632_s28 = smov (!%p122_p2), 24  }
   0xb   : > { %s712_s10 = smov (!%p146_p3, %s533_s10), 1  ;;  %vm163_vm0 = vcmask 64512   ;;  %vm193_vm1 = vcmask 130048   ;;  %vm464_vm2 = vcmask 195584   ;;  %vm466_vm3 = vcmask 261120  }
   0xc   : > { %s560_s11 = sshll.u32 %s712_s10, 4  ;;  %s538_s12 = sshll.u32 %s712_s10, 3 }
   0xd   : > { %s154_s15 = scalar_lea.vmem %s709_s1, %s560_s11  ;;  %s149_s18 = scalar_lea.vmem %s708_s0, %s538_s12 }
   0xe   : > { %v161_v0 = vld [vmem:[%s154_s15 + $0x8] sm:$0xff]  ;;  %v160_v1 = vld [vmem:[%s154_s15] sm:$0xff]  ;;  %s158_s3 = scalar_lea.vmem %s710_s2, %s538_s12 }
   0xf   : > { %542 = vmatpush.xpose.msk.msra.mxu0 %vm163_vm0, %v161_v0  ;;  %236 = vrot.lane.b32.xlu1 %v160_v1, %s623_s19  ;;  %v159_v2 = vld [vmem:[%s149_s18] sm:$0xff]  ;;  %v671_v6 = vpack.i.bf16 %v160_v1, %v161_v0 }
  0x10   : > { %238 = vrot.lane.b32.xlu0 %v161_v0, %s623_s19  ;;  %v162_v3 = vmul.f32 0.17677669, %v159_v2 }
  0x11   : > { %580 = vrot.lane.b32.xlu2 %v671_v6, %s625_s21 }
  0x13   : > { %543 = vmatpush.xpose.msk.msra.mxu0 %vm163_vm0, %v160_v1 }
  0x16   : > { %544 = vmatmul.msk.f32.vlgmr.msra.gmra.mxu0 %vm163_vm0, %v162_v3 }
  0x17   : > { %234 = vrot.lane.b32.xlu1 %v162_v3, %s623_s19 }
  0x19   : > { %310 = vrot.lane.b32.xlu2 %v161_v0, %s626_s22 }
  0x1f   : > { %382 = vrot.lane.b32.xlu1 %v161_v0, %s624_s20 }
  0x21   : > { %308 = vrot.lane.b32.xlu2 %v160_v1, %s626_s22 }
  0x27   : > { %380 = vrot.lane.b32.xlu1 %v160_v1, %s624_s20 }
  0x29   : > { %306 = vrot.lane.b32.xlu2 %v162_v3, %s626_s22 }
  0x2f   : > { %378 = vrot.lane.b32.xlu1 %v162_v3, %s624_s20 }
  0x6b   : > { %v581_v13 = vpop.permute.xlu2 %580 }
  0x6c   : > { %v582_v14 = vunpack.i.l.bf16 %v581_v13  ;;  %v583_v15 = vunpack.i.h.bf16 %v581_v13 }
  0x6e   : > { %226 = vmatpush.msra.mxu1 %v582_v14 }
  0x70   : > { %227 = vmatpush.msra.mxu1 %v583_v15 }
  0x73   : > { %v311_v16 = vpop.permute.xlu2 %310 }
  0x74   : > { %550 = vmatpush.xpose.msk.msrb.mxu1 %vm163_vm0, %v311_v16 }
  0x7b   : > { %v309_v17 = vpop.permute.xlu2 %308 }
  0x7c   : > { %551 = vmatpush.xpose.msk.msrb.mxu1 %vm163_vm0, %v309_v17 }
  0x81   : > { %v237_v4 = vpop.permute.xlu1 %236 }
  0x82   : > { %v239_v5 = vpop.permute.xlu0 %238 }
  0x83   : > { %546 = vmatpush.xpose.msk.msra.mxu2 %vm163_vm0, %v239_v5  ;;  %v307_v24 = vpop.permute.xlu2 %306 }
  0x87   : > { %547 = vmatpush.xpose.msk.msra.mxu2 %vm163_vm0, %v237_v4 }
  0x89   : > { %v235_v7 = vpop.permute.xlu1 %234 }
  0x8a   : > { %548 = vmatmul.msk.f32.vlgmr.msra.gmra.mxu2 %vm163_vm0, %v235_v7 }
  0x91   : > { %v383_v8 = vpop.permute.xlu1 %382 }
  0x92   : > { %554 = vmatpush.xpose.msk.msrb.mxu0 %vm163_vm0, %v383_v8 }
  0x93   : > { %v190_v9 = vpop.f32.mrf.mxu0 }
  0x94   : > { %v194_v10 = vsel %vm193_vm1, %v190_v9, -inf }
  0x95   : > { %195 = vmax.xlane.f32.xlu0 %v194_v10 }
  0x99   : > { %v381_v11 = vpop.permute.xlu1 %380 }
  0x9a   : > { %555 = vmatpush.xpose.msk.msrb.mxu0 %vm163_vm0, %v381_v11 }
  0xa1   : > { %v379_v12 = vpop.permute.xlu1 %378 }
  0xa2   : > { %556 = vmatmul.msk.f32.vlgmr.msrb.gmra.mxu0 %vm163_vm0, %v379_v12 }
  0xa9   : > { %585 = vrot.lane.b32.xlu0 %v671_v6, %s627_s23 }
 0x108   : > { %v196_v18 = vpop.xlane.xlu0 %195 }
 0x109   : > { %v197_v19 = vsub.f32 %v190_v9, %v196_v18 }
 0x10b   : > { %v198_v20 = vmul.f32 1.442695, %v197_v19 }
 0x10d   : > { %599 = vpow2.f32 %v198_v20  ;;  %v263_v21 = vpop.f32.mrf.mxu2 }
 0x10e   : > { %v266_v22 = vsel %vm193_vm1, %v263_v21, -inf }
 0x10f   : > { %267 = vmax.xlane.f32.xlu2 %v266_v22 }
 0x113   : > { %v600_v23 = vpop.eup %599 }
 0x114   : > { %545 = vmatmul.msk.f32.vlgmr.msra.gmra.mxu1 %vm193_vm1, %v600_v23  ;;  %v200_v43 = vsel %vm193_vm1, %v600_v23, 0.0 }
 0x11b   : > { %v586_v27 = vpop.permute.xlu0 %585 }
 0x11c   : > { %552 = vmatmul.msk.f32.vlgmr.msrb.gmra.mxu1 %vm163_vm0, %v307_v24  ;;  %v587_v28 = vunpack.i.l.bf16 %v586_v27  ;;  %v588_v29 = vunpack.i.h.bf16 %v586_v27 }
 0x11e   : > { %298 = vmatpush.msra.mxu3 %v587_v28 }
 0x11f   : > { %v407_v25 = vpop.f32.mrf.mxu0 }
 0x120   : > { %v410_v26 = vsel %vm193_vm1, %v407_v25, -inf  ;;  %299 = vmatpush.msra.mxu3 %v588_v29 }
 0x121   : > { %411 = vmax.xlane.f32.xlu0 %v410_v26 }
 0x127   : > { %590 = vrot.lane.b32.xlu2 %v671_v6, %s628_s24 }
 0x182   : > { %v268_v30 = vpop.xlane.xlu2 %267 }
 0x183   : > { %v269_v31 = vsub.f32 %v263_v21, %v268_v30 }
 0x185   : > { %v270_v32 = vmul.f32 1.442695, %v269_v31 }
 0x187   : > { %601 = vpow2.f32 %v270_v32 }
 0x18a   : > { %v591_v44 = vpop.permute.xlu2 %590 }
 0x18b   : > { %v592_v45 = vunpack.i.l.bf16 %v591_v44  ;;  %v593_v46 = vunpack.i.h.bf16 %v591_v44 }
 0x18d   : > { %v602_v33 = vpop.eup %601  ;;  %370 = vmatpush.msrb.mxu3 %v592_v45 }
 0x18e   : > { %549 = vmatmul.msk.f32.vlgmr.msra.gmra.mxu3 %vm193_vm1, %v602_v33  ;;  %v272_v34 = vsel %vm193_vm1, %v602_v33, 0.0 }
 0x18f   : > { %273 = vadd.xlane.f32.xlu2 %v272_v34  ;;  %371 = vmatpush.msrb.mxu3 %v593_v46 }
 0x191   : > { %v229_v35 = vpop.f32.mrf.mxu1 }
 0x194   : > { %v412_v36 = vpop.xlane.xlu0 %411 }
 0x195   : > { %v413_v37 = vsub.f32 %v407_v25, %v412_v36 }
 0x197   : > { %v414_v38 = vmul.f32 1.442695, %v413_v37 }
 0x199   : > { %603 = vpow2.f32 %v414_v38  ;;  %v335_v39 = vpop.f32.mrf.mxu1 }
 0x19a   : > { %v338_v40 = vsel %vm193_vm1, %v335_v39, -inf }
 0x19b   : > { %339 = vmax.xlane.f32.xlu1 %v338_v40 }
 0x19f   : > { %v604_v41 = vpop.eup %603 }
 0x1a0   : > { %v416_v42 = vsel %vm193_vm1, %v604_v41, 0.0 }
 0x1a1   : > { %417 = vadd.xlane.f32.xlu0 %v416_v42 }
 0x1a9   : > { %201 = vadd.xlane.f32.xlu0 %v200_v43 }
 0x1b4   : > { %595 = vrot.lane.b32.xlu1 %v671_v6, %s629_s25 }
 0x202   : > { %v274_v47 = vpop.xlane.xlu2 %273 }
 0x203   : > { %605 = vrcp.f32 %v274_v47 }
 0x209   : > { %v606_v49 = vpop.eup %605 }
 0x20e   : > { %v340_v48 = vpop.xlane.xlu1 %339 }
 0x20f   : > { %v341_v50 = vsub.f32 %v335_v39, %v340_v48 }
 0x211   : > { %v342_v51 = vmul.f32 1.442695, %v341_v50  ;;  %v301_v52 = vpop.f32.mrf.mxu3 }
 0x212   : > { %v305_v53 = vmul.f32 %v606_v49, %v301_v52 }
 0x213   : > { %607 = vpow2.f32 %v342_v51 }
 0x214   : > { %451 = vrot.lane.b32.xlu0 %v305_v53, %s630_s26  ;;  %v418_v63 = vpop.xlane.xlu0 %417 }
 0x219   : > { %v608_v54 = vpop.eup %607 }
 0x21a   : > { %553 = vmatmul.msk.f32.vlgmr.msrb.gmra.mxu3 %vm193_vm1, %v608_v54  ;;  %v344_v55 = vsel %vm193_vm1, %v608_v54, 0.0 }
 0x21b   : > { %345 = vadd.xlane.f32.xlu1 %v344_v55 }
 0x21c   : > { %v202_v3 = vpop.xlane.xlu0 %201 }
 0x226   : > { %v596_v56 = vpop.permute.xlu1 %595 }
 0x227   : > { %v597_v57 = vunpack.i.l.bf16 %v596_v56  ;;  %v598_v58 = vunpack.i.h.bf16 %v596_v56 }
 0x229   : > { %442 = vmatpush.msrb.mxu2 %v597_v57 }
 0x22b   : > { %443 = vmatpush.msrb.mxu2 %v598_v58 }
 0x22c   : > { %557 = vmatmul.msk.f32.vlgmr.msrb.gmra.mxu2 %vm193_vm1, %v604_v41 }
 0x286   : > { %v452_v4 = vpop.permute.xlu0 %451 }
 0x28e   : > { %v346_v59 = vpop.xlane.xlu1 %345 }
 0x28f   : > { %609 = vrcp.f32 %v346_v59 }
 0x290   : > { %611 = vrcp.f32 %v418_v63 }
 0x291   : > { %613 = vrcp.f32 %v202_v3 }
 0x295   : > { %v610_v60 = vpop.eup %609 }
 0x296   : > { %v612_v0 = vpop.eup %611 }
 0x297   : > { %v614_v5 = vpop.eup %613 }
 0x298   : > { %v233_v6 = vmul.f32 %v614_v5, %v229_v35 }
 0x29a   : > { %v462_v8 = vsel %vm163_vm0, %v233_v6, %v452_v4 }
 0x29d   : > { %v373_v61 = vpop.f32.mrf.mxu3 }
 0x29e   : > { %v377_v62 = vmul.f32 %v610_v60, %v373_v61 }
 0x2a0   : > { %455 = vrot.lane.b32.xlu2 %v377_v62, %s631_s27 }
 0x2af   : > { %v445_v1 = vpop.f32.mrf.mxu2 }
 0x2b0   : > { %v449_v2 = vmul.f32 %v612_v0, %v445_v1 }
 0x2b2   : > { %459 = vrot.lane.b32.xlu0 %v449_v2, %s632_s28 }
 0x2fa   : > { %v456_v7 = vpop.permute.xlu2 %455 }
 0x2fb   : > { %v463_v9 = vsel %vm193_vm1, %v462_v8, %v456_v7 }
 0x324   : > { %v460_v10 = vpop.permute.xlu0 %459 }
 0x325   : > { %v465_v11 = vsel %vm464_vm2, %v463_v9, %v460_v10 }
 0x326   : > { %467 = vst.msk [vmem:[%s158_s3] sm:$0xff] %vm466_vm3, %v465_v11 }
 0x327 PF: > { %s12_s9 = sadd.s32 1, %s621_s9  }
 0x328   : > { %p9_p4 = scmp.ge.s32.totalorder %s12_s9, 4  }
 0x32a   :  { %11 = sbr.rel (!%p9_p4) target bundleno = 1 (0x1), region = 61 }

// kernel: transformer_decoder_forward.31
= control target key start
LH: loop header
LB: loop body
LE: loop exit
PB: predicated region body
PF: predicated region fallthrough
CT: control target
= control target key end

     0   :  { %11 = vsyncpa [#allocation3], 0  ;;  %s198_s24 = smov [#allocation2]   ;;  %s199_s26 = smov 128   ;;  %s275_s0 = inlined_call_operand.vmem [shape: f32[16,32], index: 0, kind: input, shape index: {}]   ;;  %s276_s1 = inlined_call_operand.hbm [shape: f32[32,32], index: 1, kind: input, shape index: {}]   ;;  %s277_s2 = inlined_call_operand.vmem [shape: f32[1,32], index: 2, kind: input, shape index: {}]   ;;  %s278_s3 = inlined_call_operand.vmem [shape: f32[16,32], index: 3, kind: input, shape index: {}]   ;;  %s279_s4 = inlined_call_operand.vmem [shape: f32[1,32], index: 4, kind: input, shape index: {}]   ;;  %s280_s5 = inlined_call_operand.vmem [shape: f32[1,32], index: 5, kind: input, shape index: {}]   ;;  %s281_s6 = inlined_call_operand.vmem [shape: f32[16,32], index: 6, kind: output, shape index: {}]  }
   0x1   :  { %s18_s23 = sshll.u32 %s276_s1, 4  ;;  %s20_s25 = sshll.u32 %s198_s24, 4  ;;  %s19_s23 = int_to_ptr.hbm [resolvable:$true] %s18_s23  ;;  %s21_s25 = int_to_ptr.vmem [resolvable:$true] %s20_s25 }
   0x2   :  { %s200_s27 = smov 8  }
   0x3   :  { %26 = dma.hbm_to_vmem [thread:$0]  %s19_s23, 512, %s21_s25, [#allocation3], %s199_s26, %s199_s26, %s200_s27  }
   0x4   :  { %196 = dma.done.wait [#allocation3], 512  }
   0x5   :  { %197 = vsyncadd [#allocation3], 4294966784  ;;  %v44_v0 = vld [vmem:[#allocation2 + $0x18] sm:$0xff]  ;;  %v43_v1 = vld [vmem:[#allocation2 + $0x10] sm:$0xff]  ;;  %vm49_vm0 = vcmask 261120   ;;  %v201_v17 = vmov 32.0  }
   0x6   :  { %68 = vmatpush.msra.mxu0 %v44_v0  ;;  %155 = vmatpush.msra.mxu1 %v44_v0  ;;  %v42_v2 = vld [vmem:[#allocation2 + $0x8] sm:$0xff]  ;;  %v41_v3 = vld [vmem:[#allocation2] sm:$0xff]  ;;  %166 = vrcp.f32 %v201_v17 }
   0x7   :  { %v39_v4 = vld [vmem:[%s275_s0] sm:$0xff]  ;;  %v40_v5 = vld [vmem:[%s275_s0 + $0x8] sm:$0xff] }
   0x8   :  { %69 = vmatpush.msra.mxu0 %v43_v1  ;;  %156 = vmatpush.msra.mxu1 %v43_v1  ;;  %v163_v6 = vld [vmem:[%s277_s2] ss:$0 sm:$0xff]  ;;  %v80_v13 = vld [vmem:[%s278_s3 + $0x8] sm:$0xff] }
   0x9   :  { %v79_v8 = vld [vmem:[%s278_s3] sm:$0xff] }
   0xa   :  { %70 = vmatpush.msra.mxu0 %v42_v2  ;;  %157 = vmatpush.msra.mxu1 %v42_v2  ;;  %v164_v48 = vld [vmem:[%s279_s4] ss:$0 sm:$0xff] }
   0xb   :  { %v165_v51 = vld [vmem:[%s280_s5] ss:$0 sm:$0xff] }
   0xc   :  { %71 = vmatpush.msra.mxu0 %v41_v3  ;;  %158 = vmatpush.msra.mxu1 %v41_v3  ;;  %v167_v18 = vpop.eup %166 }
   0xd   :  { %153 = vmatmul.msk.f32.vlgmr.msra.gmra.mxu0 %vm49_vm0, %v39_v4  ;;  %154 = vmatmul.msk.f32.vlgmr.msra.gmra.mxu1 %vm49_vm0, %v40_v5  ;;  %v90_v19 = vmul.f32 32.0, %v167_v18  ;;  %vm94_vm1 = vweird.f32 %v167_v18 }
   0xf   :  { %v91_v20 = vsub.f32 1.0, %v90_v19 }
  0x11   :  { %v92_v21 = vmul.f32 %v167_v18, %v91_v20 }
  0x13   :  { %v93_v22 = vadd.f32 %v167_v18, %v92_v21 }
  0x15   :  { %v95_v23 = vsel %vm94_vm1, %v167_v18, %v93_v22 }
  0x8a   :  { %v73_v7 = vpop.f32.mrf.mxu0  ;;  %v76_v9 = vpop.f32.mrf.mxu1 }
  0x8b   :  { %v74_v10 = vadd.f32 %v163_v6, %v73_v7  ;;  %v77_v12 = vadd.f32 %v163_v6, %v76_v9 }
  0x8d   :  { %v81_v11 = vadd.f32 %v79_v8, %v74_v10  ;;  %v82_v15 = vadd.f32 %v80_v13, %v77_v12 }
  0x8f   :  { %v83_v14 = vsel %vm49_vm0, %v81_v11, 0.0  ;;  %v86_v16 = vsel %vm49_vm0, %v82_v15, 0.0 }
  0x90   :  { %84 = vadd.xlane.f32.xlu0 %v83_v14 }
  0x98   :  { %87 = vadd.xlane.f32.xlu0 %v86_v16 }
 0x103   :  { %v85_v24 = vpop.xlane.xlu0 %84 }
 0x104   :  { %v96_v25 = vmul.f32 %v95_v23, %v85_v24 }
 0x106   :  { %v98_v26 = vsub.f32 %v81_v11, %v96_v25 }
 0x108   :  { %v100_v27 = vmul.f32 %v98_v26, %v98_v26 }
 0x10a   :  { %v102_v28 = vsel %vm49_vm0, %v100_v27, 0.0 }
 0x10b   :  { %103 = vadd.xlane.f32.xlu1 %v102_v28  ;;  %v88_v29 = vpop.xlane.xlu0 %87 }
 0x10c   :  { %v97_v30 = vmul.f32 %v95_v23, %v88_v29 }
 0x10e   :  { %v99_v31 = vsub.f32 %v82_v15, %v97_v30 }
 0x110   :  { %v101_v32 = vmul.f32 %v99_v31, %v99_v31 }
 0x112   :  { %v105_v33 = vsel %vm49_vm0, %v101_v32, 0.0 }
 0x113   :  { %106 = vadd.xlane.f32.xlu1 %v105_v33 }
 0x17e   :  { %v104_v34 = vpop.xlane.xlu1 %103 }
 0x17f   :  { %v108_v35 = vmul.f32 %v104_v34, %v95_v23 }
 0x181   :  { %v110_v36 = vadd.f32 1e-05, %v108_v35 }
 0x183   :  { %168 = vrsqrt.f32 %v110_v36  ;;  %vm118_vm3 = vweird.f32 %v110_v36 }
 0x186   :  { %v107_v37 = vpop.xlane.xlu1 %106 }
 0x187   :  { %v109_v38 = vmul.f32 %v107_v37, %v95_v23 }
 0x189   :  { %v169_v39 = vpop.eup %168  ;;  %v111_v40 = vadd.f32 1e-05, %v109_v38 }
 0x18a   :  { %v113_v41 = vmul.f32 %v169_v39, %v110_v36  ;;  %vm119_vm2 = vweird.f32 %v169_v39 }
 0x18b   :  { %170 = vrsqrt.f32 %v111_v40  ;;  %vm120_vm4 = vmor %vm118_vm3, %vm119_vm2  ;;  %vm128_vm6 = vweird.f32 %v111_v40 }
 0x18c   :  { %v114_v42 = vmul.f32 %v169_v39, %v113_v41 }
 0x18e   :  { %v115_v43 = vmul.f32 0.5, %v114_v42 }
 0x190   :  { %v116_v44 = vsub.f32 1.5, %v115_v43 }
 0x191   :  { %v171_v45 = vpop.eup %170 }
 0x192   :  { %v117_v46 = vmul.f32 %v169_v39, %v116_v44  ;;  %v123_v47 = vmul.f32 %v171_v45, %v111_v40  ;;  %vm129_vm5 = vweird.f32 %v171_v45 }
 0x193   :  { %vm130_vm7 = vmor %vm128_vm6, %vm129_vm5 }
 0x194   :  { %v121_v49 = vsel %vm120_vm4, %v169_v39, %v117_v46  ;;  %v124_v50 = vmul.f32 %v171_v45, %v123_v47 }
 0x195   :  { %v132_v52 = vmul.f32 %v121_v49, %v98_v26 }
 0x196   :  { %v125_v53 = vmul.f32 0.5, %v124_v50 }
 0x197   :  { %v138_v54 = vmul.f32 %v164_v48, %v132_v52 }
 0x198   :  { %v126_v55 = vsub.f32 1.5, %v125_v53 }
 0x199   :  { %v144_v56 = vadd.f32 %v165_v51, %v138_v54 }
 0x19a   :  { %v127_v57 = vmul.f32 %v171_v45, %v126_v55 }
 0x19b   :  { %146 = vst.msk [vmem:[%s281_s6] sm:$0xff] %vm49_vm0, %v144_v56 }
 0x19c   :  { %v131_v58 = vsel %vm130_vm7, %v171_v45, %v127_v57 }
 0x19d   :  { %v133_v59 = vmul.f32 %v131_v58, %v99_v31 }
 0x19f   :  { %v139_v60 = vmul.f32 %v164_v48, %v133_v59 }
 0x1a1   :  { %v145_v61 = vadd.f32 %v165_v51, %v139_v60 }
 0x1a3   :  { %147 = vst.msk [vmem:[%s281_s6 + $0x8] sm:$0xff] %vm49_vm0, %v145_v61 }
 0x1a4   :  { %152 = vsyncpa [#allocation3], 1 }

// kernel: transformer_decoder_forward.33
= control target key start
LH: loop header
LB: loop body
LE: loop exit
PB: predicated region body
PF: predicated region fallthrough
CT: control target
= control target key end

     0   :  { %vm32_vm0 = vcmask 261120   ;;  %s131_s1 = inlined_call_operand.vmem [shape: f32[32,128], index: 1, kind: input, shape index: {}]   ;;  %s132_s2 = inlined_call_operand.vmem [shape: f32[1,128], index: 2, kind: input, shape index: {}]   ;;  %s133_s0 = inlined_call_operand.vmem [shape: f32[16,32], index: 0, kind: input, shape index: {}]   ;;  %s134_s3 = inlined_call_operand.vmem [shape: f32[16,128], index: 3, kind: output, shape index: {}]  }
   0x1   :  { %v31_v0 = vld [vmem:[%s131_s1 + $0x18] sm:$0xff]  ;;  %v30_v1 = vld [vmem:[%s131_s1 + $0x10] sm:$0xff]  ;;  %v29_v2 = vld [vmem:[%s131_s1 + $0x8] sm:$0xff] }
   0x2   :  { %51 = vmatpush.msra.mxu0 %v31_v0  ;;  %79 = vmatpush.msra.mxu1 %v31_v0  ;;  %v28_v3 = vld [vmem:[%s131_s1] sm:$0xff]  ;;  %v27_v5 = vld [vmem:[%s133_s0 + $0x8] sm:$0xff] }
   0x3   :  { %v26_v4 = vld [vmem:[%s133_s0] sm:$0xff] }
   0x4   :  { %52 = vmatpush.msra.mxu0 %v30_v1  ;;  %80 = vmatpush.msra.mxu1 %v30_v1  ;;  %v83_v6 = vld [vmem:[%s132_s2] ss:$0 sm:$0xff] }
   0x6   :  { %53 = vmatpush.msra.mxu0 %v29_v2  ;;  %81 = vmatpush.msra.mxu1 %v29_v2 }
   0x8   :  { %54 = vmatpush.msra.mxu0 %v28_v3  ;;  %82 = vmatpush.msra.mxu1 %v28_v3 }
   0x9   :  { %77 = vmatmul.msk.f32.vlgmr.msra.gmra.mxu0 %vm32_vm0, %v26_v4  ;;  %78 = vmatmul.msk.f32.vlgmr.msra.gmra.mxu1 %vm32_vm0, %v27_v5 }
  0x86   :  { %v56_v7 = vpop.f32.mrf.mxu0  ;;  %v59_v8 = vpop.f32.mrf.mxu1 }
  0x87   :  { %v62_v9 = vadd.f32 %v83_v6, %v56_v7  ;;  %v63_v10 = vadd.f32 %v83_v6, %v59_v8 }
  0x89   :  { %71 = vst [vmem:[%s134_s3] sm:$0xff] %v62_v9 }
  0x8a   :  { %72 = vst [vmem:[%s134_s3 + $0x8] sm:$0xff] %v63_v10 }

</bundles_post_ra>
